<compile_context>
chip_gen: v6e
topology: v6e:2x2x1
jax: 0.10.0
libtpu: 0.0.40
codegen_flags: <defaults>
</compile_context>

<pallas_src>
import functools

import jax
import jax.numpy as jnp
from jax.experimental import pallas as pl
from jax.experimental.pallas import tpu as pltpu


def _encoder_gru_kernel(x_ref, wi_ref, wh_ref, bi_ref, bhn_ref, h0_ref,
                        out_ref, hout_ref, *, seq_len, hp):
    """Fused-gate GRU recurrence on 128-lane-padded activations.

    x_ref   : (S, Hp)   f32 VMEM   embedded inputs (gathered + padded in wrapper)
    wi_ref  : (Hp, 3Hp) f32 VMEM   padded w_ih.T, gate columns at 0/Hp/2Hp
    wh_ref  : (Hp, 3Hp) f32 VMEM   padded w_hh.T
    bi_ref  : (1, 3Hp)  f32 VMEM   b_ih + [b_hr, b_hz, 0]   (r/z h-bias folded in)
    bhn_ref : (1, Hp)   f32 VMEM   b_hn (must stay inside the r*(...) term)
    h0_ref  : (1, Hp)   f32 VMEM
    out_ref : (S, Hp)   f32 VMEM output
    hout_ref: (1, Hp)   f32 VMEM output
    """
    Hp = hp

    # ---- hoisted input-side projection: one (S,Hp) @ (Hp,3Hp) matmul -------
    gi_all = (jnp.dot(x_ref[...], wi_ref[...],
                      preferred_element_type=jnp.float32)
              + bi_ref[...])                                       # (S, 3Hp)

    wh = wh_ref[...]                                               # loop-invariant
    bhn = bhn_ref[...]

    # ---- recurrence: one MXU matmul + short VPU/EUP chain per step ---------
    h = h0_ref[...]                                                # (1, Hp)
    for t in range(seq_len):
        gi = gi_all[t:t + 1, :]                                    # static slice
        gh = jnp.dot(h, wh, preferred_element_type=jnp.float32)    # (1, 3Hp)
        r = jax.nn.sigmoid(gi[:, 0:Hp] + gh[:, 0:Hp])
        z = jax.nn.sigmoid(gi[:, Hp:2 * Hp] + gh[:, Hp:2 * Hp])
        n = jnp.tanh(gi[:, 2 * Hp:3 * Hp] + r * (gh[:, 2 * Hp:3 * Hp] + bhn))
        h = n + z * (h - n)                                        # == (1-z)*n + z*h
        out_ref[pl.ds(t, 1), :] = h                                # lane-dense store

    hout_ref[...] = h


def encoder_rnn_forward(word_inputs, hidden, emb, w_ih, w_hh, b_ih, b_hh):
    """Pallas equivalent of EncoderRNN.forward (n_layers=1).

    word_inputs: (S,) int32
    hidden     : (1, 1, H) f32   (n_layers, batch=1, H)
    emb        : (V, H) f32
    w_ih, w_hh : (3H, H) f32     (PyTorch GRU convention, rows = [r, z, n])
    b_ih, b_hh : (3H,) f32
    returns (output (S, 1, H), hidden (1, 1, H))
    """
    seq_len = int(word_inputs.shape[0])
    V, H = emb.shape
    Hp = ((H + 127) // 128) * 128        # pad hidden to full 128-lane width

    f32 = jnp.float32

    # ---- embedding gather in the wrapper (no table in VMEM) ----------------
    # Note: out-of-range ids clamp (JAX gather semantics) instead of erroring
    # like PyTorch -- documented behavioral difference.
    ids = jnp.clip(word_inputs.astype(jnp.int32), 0, V - 1)
    x_all = emb[ids].astype(f32)                                   # (S, H)
    x_pad = jnp.zeros((seq_len, Hp), f32).at[:, :H].set(x_all)     # (S, Hp)

    # ---- pad each gate slab to Hp lanes; gate columns at 0 / Hp / 2Hp ------
    def pad_gate_weights(w):                                       # w: (3H, H)
        out = jnp.zeros((Hp, 3 * Hp), f32)
        for g in range(3):
            out = out.at[:H, g * Hp:g * Hp + H].set(w[g * H:(g + 1) * H, :].T)
        return out

    wi = pad_gate_weights(w_ih)                                    # (Hp, 3Hp)
    wh = pad_gate_weights(w_hh)                                    # (Hp, 3Hp)

    # Fold h-side r/z biases into the hoisted bias; b_hn must stay separate
    # (nn.GRU: n = tanh(W_in x + b_in + r * (W_hn h + b_hn))).
    bi = jnp.zeros((1, 3 * Hp), f32)
    bi = bi.at[0, 0:H].set(b_ih[0:H] + b_hh[0:H])                  # r
    bi = bi.at[0, Hp:Hp + H].set(b_ih[H:2 * H] + b_hh[H:2 * H])    # z
    bi = bi.at[0, 2 * Hp:2 * Hp + H].set(b_ih[2 * H:3 * H])        # n (input bias)
    bhn = jnp.zeros((1, Hp), f32).at[0, :H].set(b_hh[2 * H:3 * H]) # n (hidden bias)

    h0 = jnp.zeros((1, Hp), f32).at[0, :H].set(hidden.reshape(H))

    kernel = functools.partial(_encoder_gru_kernel, seq_len=seq_len, hp=Hp)
    vmem = pl.BlockSpec(memory_space=pltpu.MemorySpace.VMEM)

    out_p, h_last_p = pl.pallas_call(
        kernel,
        out_shape=(jax.ShapeDtypeStruct((seq_len, Hp), f32),
                   jax.ShapeDtypeStruct((1, Hp), f32)),
        in_specs=[vmem] * 6,
        out_specs=(vmem, vmem),
    )(x_pad, wi, wh, bi, bhn, h0)

    out = out_p[:, :H].reshape(seq_len, 1, H)
    h_last = h_last_p[:, :H].reshape(1, 1, H)
    return out, h_last


def encoder_rnn_reference(word_inputs, hidden, emb, w_ih, w_hh, b_ih, b_hh):
    """Pure-JAX reference mirroring PyTorch nn.Embedding + nn.GRU (1 layer)."""
    seq_len = word_inputs.shape[0]
    H = emb.shape[1]
    x_seq = emb[word_inputs]                              # (S, H)
    h = hidden.reshape(1, H)
    outs = []
    for t in range(seq_len):
        x = x_seq[t:t + 1]
        gi = x @ w_ih.T + b_ih
        gh = h @ w_hh.T + b_hh
        i_r, i_z, i_n = jnp.split(gi, 3, axis=1)
        h_r, h_z, h_n = jnp.split(gh, 3, axis=1)
        r = jax.nn.sigmoid(i_r + h_r)
        z = jax.nn.sigmoid(i_z + h_z)
        n = jnp.tanh(i_n + r * h_n)
        h = (1.0 - z) * n + z * h
        outs.append(h)
    return jnp.concatenate(outs, axis=0).reshape(seq_len, 1, H), h.reshape(1, 1, H)


if __name__ == "__main__":
    input_size = 50      # vocab size
    hidden_size = 32
    seq_len = 8
    n_layers = 1

    key = jax.random.PRNGKey(0)
    k_ids, k_emb, k_wih, k_whh, k_bih, k_bhh = jax.random.split(key, 6)

    bound = 1.0 / jnp.sqrt(hidden_size)
    word_inputs = jax.random.randint(k_ids, (seq_len,), 0, input_size, dtype=jnp.int32)
    emb = jax.random.normal(k_emb, (input_size, hidden_size), dtype=jnp.float32)
    w_ih = jax.random.uniform(k_wih, (3 * hidden_size, hidden_size),
                              minval=-bound, maxval=bound, dtype=jnp.float32)
    w_hh = jax.random.uniform(k_whh, (3 * hidden_size, hidden_size),
                              minval=-bound, maxval=bound, dtype=jnp.float32)
    b_ih = jax.random.uniform(k_bih, (3 * hidden_size,),
                              minval=-bound, maxval=bound, dtype=jnp.float32)
    b_hh = jax.random.uniform(k_bhh, (3 * hidden_size,),
                              minval=-bound, maxval=bound, dtype=jnp.float32)

    hidden0 = jnp.zeros((n_layers, 1, hidden_size), dtype=jnp.float32)  # init_hidden()

    out, h_last = encoder_rnn_forward(word_inputs, hidden0,
                                      emb, w_ih, w_hh, b_ih, b_hh)
    out = jax.block_until_ready(out)
    h_last = jax.block_until_ready(h_last)

    out_ref, h_ref = encoder_rnn_reference(word_inputs, hidden0,
                                           emb, w_ih, w_hh, b_ih, b_hh)
    assert out.shape == (seq_len, 1, hidden_size)
    assert h_last.shape == (n_layers, 1, hidden_size)
    assert jnp.allclose(out, out_ref, atol=1e-4, rtol=1e-4)
    assert jnp.allclose(h_last, h_ref, atol=1e-4, rtol=1e-4)

    print("KERNEL_OK")
</pallas_src>

<mosaic_0001>
module attributes {stable_mosaic.version = 11 : i64} {
  func.func @_encoder_gru_kernel(%arg0: memref<8x128xf32, #tpu.memory_space<vmem>>, %arg1: memref<128x384xf32, #tpu.memory_space<vmem>>, %arg2: memref<128x384xf32, #tpu.memory_space<vmem>>, %arg3: memref<1x384xf32, #tpu.memory_space<vmem>>, %arg4: memref<1x128xf32, #tpu.memory_space<vmem>>, %arg5: memref<1x128xf32, #tpu.memory_space<vmem>>, %arg6: memref<8x128xf32, #tpu.memory_space<vmem>>, %arg7: memref<1x128xf32, #tpu.memory_space<vmem>>) attributes {dimension_semantics = [], scalar_prefetch = 0 : i64, scratch_operands = 0 : i64, tpu.core_type = #tpu.core_type<tc>} {
    %c0 = arith.constant 0 : index
    %c0_0 = arith.constant 0 : index
    %0 = vector.load %arg0[%c0, %c0_0] : memref<8x128xf32, #tpu.memory_space<vmem>>, vector<8x128xf32>
    %c0_1 = arith.constant 0 : index
    %c0_2 = arith.constant 0 : index
    %1 = vector.load %arg1[%c0_1, %c0_2] : memref<128x384xf32, #tpu.memory_space<vmem>>, vector<128x384xf32>
    %cst = arith.constant dense<0.000000e+00> : vector<8x384xf32>
    %2 = tpu.matmul %0, %1, %cst {dimension_numbers = #tpu.dot_dimension_numbers<[1], [0], [0], [1], [0, 0, 1, 1], [], []>} : vector<8x128xf32>, vector<128x384xf32>, vector<8x384xf32> -> vector<8x384xf32>
    %c0_3 = arith.constant 0 : index
    %c0_4 = arith.constant 0 : index
    %3 = vector.load %arg3[%c0_3, %c0_4] : memref<1x384xf32, #tpu.memory_space<vmem>>, vector<1x384xf32>
    %4 = vector.broadcast %3 : vector<1x384xf32> to vector<8x384xf32>
    %5 = arith.addf %2, %4 : vector<8x384xf32>
    %c0_5 = arith.constant 0 : index
    %c0_6 = arith.constant 0 : index
    %6 = vector.load %arg2[%c0_5, %c0_6] : memref<128x384xf32, #tpu.memory_space<vmem>>, vector<128x384xf32>
    %c0_7 = arith.constant 0 : index
    %c0_8 = arith.constant 0 : index
    %7 = vector.load %arg4[%c0_7, %c0_8] : memref<1x128xf32, #tpu.memory_space<vmem>>, vector<1x128xf32>
    %c0_9 = arith.constant 0 : index
    %c0_10 = arith.constant 0 : index
    %8 = vector.load %arg5[%c0_9, %c0_10] : memref<1x128xf32, #tpu.memory_space<vmem>>, vector<1x128xf32>
    %9 = vector.extract_strided_slice %5 {offsets = [0, 0], sizes = [1, 384], strides = [1, 1]} : vector<8x384xf32> to vector<1x384xf32>
    %cst_11 = arith.constant dense<0.000000e+00> : vector<1x384xf32>
    %10 = tpu.matmul %8, %6, %cst_11 {dimension_numbers = #tpu.dot_dimension_numbers<[1], [0], [0], [1], [0, 0, 1, 1], [], []>} : vector<1x128xf32>, vector<128x384xf32>, vector<1x384xf32> -> vector<1x384xf32>
    %11 = vector.extract_strided_slice %9 {offsets = [0, 0], sizes = [1, 128], strides = [1, 1]} : vector<1x384xf32> to vector<1x128xf32>
    %12 = vector.extract_strided_slice %10 {offsets = [0, 0], sizes = [1, 128], strides = [1, 1]} : vector<1x384xf32> to vector<1x128xf32>
    %13 = arith.addf %11, %12 : vector<1x128xf32>
    %14 = arith.negf %13 : vector<1x128xf32>
    %15 = math.exp %14 : vector<1x128xf32>
    %cst_12 = arith.constant 1.000000e+00 : f32
    %16 = vector.broadcast %cst_12 : f32 to vector<1x128xf32>
    %17 = arith.addf %16, %15 : vector<1x128xf32>
    %18 = arith.divf %16, %17 : vector<1x128xf32>
    %19 = vector.extract_strided_slice %9 {offsets = [0, 128], sizes = [1, 128], strides = [1, 1]} : vector<1x384xf32> to vector<1x128xf32>
    %20 = vector.extract_strided_slice %10 {offsets = [0, 128], sizes = [1, 128], strides = [1, 1]} : vector<1x384xf32> to vector<1x128xf32>
    %21 = arith.addf %19, %20 : vector<1x128xf32>
    %22 = arith.negf %21 : vector<1x128xf32>
    %23 = math.exp %22 : vector<1x128xf32>
    %cst_13 = arith.constant 1.000000e+00 : f32
    %24 = vector.broadcast %cst_13 : f32 to vector<1x128xf32>
    %25 = arith.addf %24, %23 : vector<1x128xf32>
    %26 = arith.divf %24, %25 : vector<1x128xf32>
    %27 = vector.extract_strided_slice %9 {offsets = [0, 256], sizes = [1, 128], strides = [1, 1]} : vector<1x384xf32> to vector<1x128xf32>
    %28 = vector.extract_strided_slice %10 {offsets = [0, 256], sizes = [1, 128], strides = [1, 1]} : vector<1x384xf32> to vector<1x128xf32>
    %29 = arith.addf %28, %7 : vector<1x128xf32>
    %30 = arith.mulf %18, %29 : vector<1x128xf32>
    %31 = arith.addf %27, %30 : vector<1x128xf32>
    %32 = math.tanh %31 : vector<1x128xf32>
    %33 = arith.subf %8, %32 : vector<1x128xf32>
    %34 = arith.mulf %26, %33 : vector<1x128xf32>
    %35 = arith.addf %32, %34 : vector<1x128xf32>
    %c0_14 = arith.constant 0 : index
    %c0_15 = arith.constant 0 : index
    %36 = vector.load %arg6[%c0_14, %c0_15] : memref<8x128xf32, #tpu.memory_space<vmem>>, vector<1x128xf32>
    tpu.vector_store %arg6[%c0_14, %c0_15], %35 {strides = array<i32>} : memref<8x128xf32, #tpu.memory_space<vmem>>, vector<1x128xf32>,
    %37 = vector.extract_strided_slice %5 {offsets = [1, 0], sizes = [1, 384], strides = [1, 1]} : vector<8x384xf32> to vector<1x384xf32>
    %cst_16 = arith.constant dense<0.000000e+00> : vector<1x384xf32>
    %38 = tpu.matmul %35, %6, %cst_16 {dimension_numbers = #tpu.dot_dimension_numbers<[1], [0], [0], [1], [0, 0, 1, 1], [], []>} : vector<1x128xf32>, vector<128x384xf32>, vector<1x384xf32> -> vector<1x384xf32>
    %39 = vector.extract_strided_slice %37 {offsets = [0, 0], sizes = [1, 128], strides = [1, 1]} : vector<1x384xf32> to vector<1x128xf32>
    %40 = vector.extract_strided_slice %38 {offsets = [0, 0], sizes = [1, 128], strides = [1, 1]} : vector<1x384xf32> to vector<1x128xf32>
    %41 = arith.addf %39, %40 : vector<1x128xf32>
    %42 = arith.negf %41 : vector<1x128xf32>
    %43 = math.exp %42 : vector<1x128xf32>
    %cst_17 = arith.constant 1.000000e+00 : f32
    %44 = vector.broadcast %cst_17 : f32 to vector<1x128xf32>
    %45 = arith.addf %44, %43 : vector<1x128xf32>
    %46 = arith.divf %44, %45 : vector<1x128xf32>
    %47 = vector.extract_strided_slice %37 {offsets = [0, 128], sizes = [1, 128], strides = [1, 1]} : vector<1x384xf32> to vector<1x128xf32>
    %48 = vector.extract_strided_slice %38 {offsets = [0, 128], sizes = [1, 128], strides = [1, 1]} : vector<1x384xf32> to vector<1x128xf32>
    %49 = arith.addf %47, %48 : vector<1x128xf32>
    %50 = arith.negf %49 : vector<1x128xf32>
    %51 = math.exp %50 : vector<1x128xf32>
    %cst_18 = arith.constant 1.000000e+00 : f32
    %52 = vector.broadcast %cst_18 : f32 to vector<1x128xf32>
    %53 = arith.addf %52, %51 : vector<1x128xf32>
    %54 = arith.divf %52, %53 : vector<1x128xf32>
    %55 = vector.extract_strided_slice %37 {offsets = [0, 256], sizes = [1, 128], strides = [1, 1]} : vector<1x384xf32> to vector<1x128xf32>
    %56 = vector.extract_strided_slice %38 {offsets = [0, 256], sizes = [1, 128], strides = [1, 1]} : vector<1x384xf32> to vector<1x128xf32>
    %57 = arith.addf %56, %7 : vector<1x128xf32>
    %58 = arith.mulf %46, %57 : vector<1x128xf32>
    %59 = arith.addf %55, %58 : vector<1x128xf32>
    %60 = math.tanh %59 : vector<1x128xf32>
    %61 = arith.subf %35, %60 : vector<1x128xf32>
    %62 = arith.mulf %54, %61 : vector<1x128xf32>
    %63 = arith.addf %60, %62 : vector<1x128xf32>
    %c1 = arith.constant 1 : index
    %c0_19 = arith.constant 0 : index
    %64 = vector.load %arg6[%c1, %c0_19] : memref<8x128xf32, #tpu.memory_space<vmem>>, vector<1x128xf32>
    tpu.vector_store %arg6[%c1, %c0_19], %63 {strides = array<i32>} : memref<8x128xf32, #tpu.memory_space<vmem>>, vector<1x128xf32>,
    %65 = vector.extract_strided_slice %5 {offsets = [2, 0], sizes = [1, 384], strides = [1, 1]} : vector<8x384xf32> to vector<1x384xf32>
    %cst_20 = arith.constant dense<0.000000e+00> : vector<1x384xf32>
    %66 = tpu.matmul %63, %6, %cst_20 {dimension_numbers = #tpu.dot_dimension_numbers<[1], [0], [0], [1], [0, 0, 1, 1], [], []>} : vector<1x128xf32>, vector<128x384xf32>, vector<1x384xf32> -> vector<1x384xf32>
    %67 = vector.extract_strided_slice %65 {offsets = [0, 0], sizes = [1, 128], strides = [1, 1]} : vector<1x384xf32> to vector<1x128xf32>
    %68 = vector.extract_strided_slice %66 {offsets = [0, 0], sizes = [1, 128], strides = [1, 1]} : vector<1x384xf32> to vector<1x128xf32>
    %69 = arith.addf %67, %68 : vector<1x128xf32>
    %70 = arith.negf %69 : vector<1x128xf32>
    %71 = math.exp %70 : vector<1x128xf32>
    %cst_21 = arith.constant 1.000000e+00 : f32
    %72 = vector.broadcast %cst_21 : f32 to vector<1x128xf32>
    %73 = arith.addf %72, %71 : vector<1x128xf32>
    %74 = arith.divf %72, %73 : vector<1x128xf32>
    %75 = vector.extract_strided_slice %65 {offsets = [0, 128], sizes = [1, 128], strides = [1, 1]} : vector<1x384xf32> to vector<1x128xf32>
    %76 = vector.extract_strided_slice %66 {offsets = [0, 128], sizes = [1, 128], strides = [1, 1]} : vector<1x384xf32> to vector<1x128xf32>
    %77 = arith.addf %75, %76 : vector<1x128xf32>
    %78 = arith.negf %77 : vector<1x128xf32>
    %79 = math.exp %78 : vector<1x128xf32>
    %cst_22 = arith.constant 1.000000e+00 : f32
    %80 = vector.broadcast %cst_22 : f32 to vector<1x128xf32>
    %81 = arith.addf %80, %79 : vector<1x128xf32>
    %82 = arith.divf %80, %81 : vector<1x128xf32>
    %83 = vector.extract_strided_slice %65 {offsets = [0, 256], sizes = [1, 128], strides = [1, 1]} : vector<1x384xf32> to vector<1x128xf32>
    %84 = vector.extract_strided_slice %66 {offsets = [0, 256], sizes = [1, 128], strides = [1, 1]} : vector<1x384xf32> to vector<1x128xf32>
    %85 = arith.addf %84, %7 : vector<1x128xf32>
    %86 = arith.mulf %74, %85 : vector<1x128xf32>
    %87 = arith.addf %83, %86 : vector<1x128xf32>
    %88 = math.tanh %87 : vector<1x128xf32>
    %89 = arith.subf %63, %88 : vector<1x128xf32>
    %90 = arith.mulf %82, %89 : vector<1x128xf32>
    %91 = arith.addf %88, %90 : vector<1x128xf32>
    %c2 = arith.constant 2 : index
    %c0_23 = arith.constant 0 : index
    %92 = vector.load %arg6[%c2, %c0_23] : memref<8x128xf32, #tpu.memory_space<vmem>>, vector<1x128xf32>
    tpu.vector_store %arg6[%c2, %c0_23], %91 {strides = array<i32>} : memref<8x128xf32, #tpu.memory_space<vmem>>, vector<1x128xf32>,
    %93 = vector.extract_strided_slice %5 {offsets = [3, 0], sizes = [1, 384], strides = [1, 1]} : vector<8x384xf32> to vector<1x384xf32>
    %cst_24 = arith.constant dense<0.000000e+00> : vector<1x384xf32>
    %94 = tpu.matmul %91, %6, %cst_24 {dimension_numbers = #tpu.dot_dimension_numbers<[1], [0], [0], [1], [0, 0, 1, 1], [], []>} : vector<1x128xf32>, vector<128x384xf32>, vector<1x384xf32> -> vector<1x384xf32>
    %95 = vector.extract_strided_slice %93 {offsets = [0, 0], sizes = [1, 128], strides = [1, 1]} : vector<1x384xf32> to vector<1x128xf32>
    %96 = vector.extract_strided_slice %94 {offsets = [0, 0], sizes = [1, 128], strides = [1, 1]} : vector<1x384xf32> to vector<1x128xf32>
    %97 = arith.addf %95, %96 : vector<1x128xf32>
    %98 = arith.negf %97 : vector<1x128xf32>
    %99 = math.exp %98 : vector<1x128xf32>
    %cst_25 = arith.constant 1.000000e+00 : f32
    %100 = vector.broadcast %cst_25 : f32 to vector<1x128xf32>
    %101 = arith.addf %100, %99 : vector<1x128xf32>
    %102 = arith.divf %100, %101 : vector<1x128xf32>
    %103 = vector.extract_strided_slice %93 {offsets = [0, 128], sizes = [1, 128], strides = [1, 1]} : vector<1x384xf32> to vector<1x128xf32>
    %104 = vector.extract_strided_slice %94 {offsets = [0, 128], sizes = [1, 128], strides = [1, 1]} : vector<1x384xf32> to vector<1x128xf32>
    %105 = arith.addf %103, %104 : vector<1x128xf32>
    %106 = arith.negf %105 : vector<1x128xf32>
    %107 = math.exp %106 : vector<1x128xf32>
    %cst_26 = arith.constant 1.000000e+00 : f32
    %108 = vector.broadcast %cst_26 : f32 to vector<1x128xf32>
    %109 = arith.addf %108, %107 : vector<1x128xf32>
    %110 = arith.divf %108, %109 : vector<1x128xf32>
    %111 = vector.extract_strided_slice %93 {offsets = [0, 256], sizes = [1, 128], strides = [1, 1]} : vector<1x384xf32> to vector<1x128xf32>
    %112 = vector.extract_strided_slice %94 {offsets = [0, 256], sizes = [1, 128], strides = [1, 1]} : vector<1x384xf32> to vector<1x128xf32>
    %113 = arith.addf %112, %7 : vector<1x128xf32>
    %114 = arith.mulf %102, %113 : vector<1x128xf32>
    %115 = arith.addf %111, %114 : vector<1x128xf32>
    %116 = math.tanh %115 : vector<1x128xf32>
    %117 = arith.subf %91, %116 : vector<1x128xf32>
    %118 = arith.mulf %110, %117 : vector<1x128xf32>
    %119 = arith.addf %116, %118 : vector<1x128xf32>
    %c3 = arith.constant 3 : index
    %c0_27 = arith.constant 0 : index
    %120 = vector.load %arg6[%c3, %c0_27] : memref<8x128xf32, #tpu.memory_space<vmem>>, vector<1x128xf32>
    tpu.vector_store %arg6[%c3, %c0_27], %119 {strides = array<i32>} : memref<8x128xf32, #tpu.memory_space<vmem>>, vector<1x128xf32>,
    %121 = vector.extract_strided_slice %5 {offsets = [4, 0], sizes = [1, 384], strides = [1, 1]} : vector<8x384xf32> to vector<1x384xf32>
    %cst_28 = arith.constant dense<0.000000e+00> : vector<1x384xf32>
    %122 = tpu.matmul %119, %6, %cst_28 {dimension_numbers = #tpu.dot_dimension_numbers<[1], [0], [0], [1], [0, 0, 1, 1], [], []>} : vector<1x128xf32>, vector<128x384xf32>, vector<1x384xf32> -> vector<1x384xf32>
    %123 = vector.extract_strided_slice %121 {offsets = [0, 0], sizes = [1, 128], strides = [1, 1]} : vector<1x384xf32> to vector<1x128xf32>
    %124 = vector.extract_strided_slice %122 {offsets = [0, 0], sizes = [1, 128], strides = [1, 1]} : vector<1x384xf32> to vector<1x128xf32>
    %125 = arith.addf %123, %124 : vector<1x128xf32>
    %126 = arith.negf %125 : vector<1x128xf32>
    %127 = math.exp %126 : vector<1x128xf32>
    %cst_29 = arith.constant 1.000000e+00 : f32
    %128 = vector.broadcast %cst_29 : f32 to vector<1x128xf32>
    %129 = arith.addf %128, %127 : vector<1x128xf32>
    %130 = arith.divf %128, %129 : vector<1x128xf32>
    %131 = vector.extract_strided_slice %121 {offsets = [0, 128], sizes = [1, 128], strides = [1, 1]} : vector<1x384xf32> to vector<1x128xf32>
    %132 = vector.extract_strided_slice %122 {offsets = [0, 128], sizes = [1, 128], strides = [1, 1]} : vector<1x384xf32> to vector<1x128xf32>
    %133 = arith.addf %131, %132 : vector<1x128xf32>
    %134 = arith.negf %133 : vector<1x128xf32>
    %135 = math.exp %134 : vector<1x128xf32>
    %cst_30 = arith.constant 1.000000e+00 : f32
    %136 = vector.broadcast %cst_30 : f32 to vector<1x128xf32>
    %137 = arith.addf %136, %135 : vector<1x128xf32>
    %138 = arith.divf %136, %137 : vector<1x128xf32>
    %139 = vector.extract_strided_slice %121 {offsets = [0, 256], sizes = [1, 128], strides = [1, 1]} : vector<1x384xf32> to vector<1x128xf32>
    %140 = vector.extract_strided_slice %122 {offsets = [0, 256], sizes = [1, 128], strides = [1, 1]} : vector<1x384xf32> to vector<1x128xf32>
    %141 = arith.addf %140, %7 : vector<1x128xf32>
    %142 = arith.mulf %130, %141 : vector<1x128xf32>
    %143 = arith.addf %139, %142 : vector<1x128xf32>
    %144 = math.tanh %143 : vector<1x128xf32>
    %145 = arith.subf %119, %144 : vector<1x128xf32>
    %146 = arith.mulf %138, %145 : vector<1x128xf32>
    %147 = arith.addf %144, %146 : vector<1x128xf32>
    %c4 = arith.constant 4 : index
    %c0_31 = arith.constant 0 : index
    %148 = vector.load %arg6[%c4, %c0_31] : memref<8x128xf32, #tpu.memory_space<vmem>>, vector<1x128xf32>
    tpu.vector_store %arg6[%c4, %c0_31], %147 {strides = array<i32>} : memref<8x128xf32, #tpu.memory_space<vmem>>, vector<1x128xf32>,
    %149 = vector.extract_strided_slice %5 {offsets = [5, 0], sizes = [1, 384], strides = [1, 1]} : vector<8x384xf32> to vector<1x384xf32>
    %cst_32 = arith.constant dense<0.000000e+00> : vector<1x384xf32>
    %150 = tpu.matmul %147, %6, %cst_32 {dimension_numbers = #tpu.dot_dimension_numbers<[1], [0], [0], [1], [0, 0, 1, 1], [], []>} : vector<1x128xf32>, vector<128x384xf32>, vector<1x384xf32> -> vector<1x384xf32>
    %151 = vector.extract_strided_slice %149 {offsets = [0, 0], sizes = [1, 128], strides = [1, 1]} : vector<1x384xf32> to vector<1x128xf32>
    %152 = vector.extract_strided_slice %150 {offsets = [0, 0], sizes = [1, 128], strides = [1, 1]} : vector<1x384xf32> to vector<1x128xf32>
    %153 = arith.addf %151, %152 : vector<1x128xf32>
    %154 = arith.negf %153 : vector<1x128xf32>
    %155 = math.exp %154 : vector<1x128xf32>
    %cst_33 = arith.constant 1.000000e+00 : f32
    %156 = vector.broadcast %cst_33 : f32 to vector<1x128xf32>
    %157 = arith.addf %156, %155 : vector<1x128xf32>
    %158 = arith.divf %156, %157 : vector<1x128xf32>
    %159 = vector.extract_strided_slice %149 {offsets = [0, 128], sizes = [1, 128], strides = [1, 1]} : vector<1x384xf32> to vector<1x128xf32>
    %160 = vector.extract_strided_slice %150 {offsets = [0, 128], sizes = [1, 128], strides = [1, 1]} : vector<1x384xf32> to vector<1x128xf32>
    %161 = arith.addf %159, %160 : vector<1x128xf32>
    %162 = arith.negf %161 : vector<1x128xf32>
    %163 = math.exp %162 : vector<1x128xf32>
    %cst_34 = arith.constant 1.000000e+00 : f32
    %164 = vector.broadcast %cst_34 : f32 to vector<1x128xf32>
    %165 = arith.addf %164, %163 : vector<1x128xf32>
    %166 = arith.divf %164, %165 : vector<1x128xf32>
    %167 = vector.extract_strided_slice %149 {offsets = [0, 256], sizes = [1, 128], strides = [1, 1]} : vector<1x384xf32> to vector<1x128xf32>
    %168 = vector.extract_strided_slice %150 {offsets = [0, 256], sizes = [1, 128], strides = [1, 1]} : vector<1x384xf32> to vector<1x128xf32>
    %169 = arith.addf %168, %7 : vector<1x128xf32>
    %170 = arith.mulf %158, %169 : vector<1x128xf32>
    %171 = arith.addf %167, %170 : vector<1x128xf32>
    %172 = math.tanh %171 : vector<1x128xf32>
    %173 = arith.subf %147, %172 : vector<1x128xf32>
    %174 = arith.mulf %166, %173 : vector<1x128xf32>
    %175 = arith.addf %172, %174 : vector<1x128xf32>
    %c5 = arith.constant 5 : index
    %c0_35 = arith.constant 0 : index
    %176 = vector.load %arg6[%c5, %c0_35] : memref<8x128xf32, #tpu.memory_space<vmem>>, vector<1x128xf32>
    tpu.vector_store %arg6[%c5, %c0_35], %175 {strides = array<i32>} : memref<8x128xf32, #tpu.memory_space<vmem>>, vector<1x128xf32>,
    %177 = vector.extract_strided_slice %5 {offsets = [6, 0], sizes = [1, 384], strides = [1, 1]} : vector<8x384xf32> to vector<1x384xf32>
    %cst_36 = arith.constant dense<0.000000e+00> : vector<1x384xf32>
    %178 = tpu.matmul %175, %6, %cst_36 {dimension_numbers = #tpu.dot_dimension_numbers<[1], [0], [0], [1], [0, 0, 1, 1], [], []>} : vector<1x128xf32>, vector<128x384xf32>, vector<1x384xf32> -> vector<1x384xf32>
    %179 = vector.extract_strided_slice %177 {offsets = [0, 0], sizes = [1, 128], strides = [1, 1]} : vector<1x384xf32> to vector<1x128xf32>
    %180 = vector.extract_strided_slice %178 {offsets = [0, 0], sizes = [1, 128], strides = [1, 1]} : vector<1x384xf32> to vector<1x128xf32>
    %181 = arith.addf %179, %180 : vector<1x128xf32>
    %182 = arith.negf %181 : vector<1x128xf32>
    %183 = math.exp %182 : vector<1x128xf32>
    %cst_37 = arith.constant 1.000000e+00 : f32
    %184 = vector.broadcast %cst_37 : f32 to vector<1x128xf32>
    %185 = arith.addf %184, %183 : vector<1x128xf32>
    %186 = arith.divf %184, %185 : vector<1x128xf32>
    %187 = vector.extract_strided_slice %177 {offsets = [0, 128], sizes = [1, 128], strides = [1, 1]} : vector<1x384xf32> to vector<1x128xf32>
    %188 = vector.extract_strided_slice %178 {offsets = [0, 128], sizes = [1, 128], strides = [1, 1]} : vector<1x384xf32> to vector<1x128xf32>
    %189 = arith.addf %187, %188 : vector<1x128xf32>
    %190 = arith.negf %189 : vector<1x128xf32>
    %191 = math.exp %190 : vector<1x128xf32>
    %cst_38 = arith.constant 1.000000e+00 : f32
    %192 = vector.broadcast %cst_38 : f32 to vector<1x128xf32>
    %193 = arith.addf %192, %191 : vector<1x128xf32>
    %194 = arith.divf %192, %193 : vector<1x128xf32>
    %195 = vector.extract_strided_slice %177 {offsets = [0, 256], sizes = [1, 128], strides = [1, 1]} : vector<1x384xf32> to vector<1x128xf32>
    %196 = vector.extract_strided_slice %178 {offsets = [0, 256], sizes = [1, 128], strides = [1, 1]} : vector<1x384xf32> to vector<1x128xf32>
    %197 = arith.addf %196, %7 : vector<1x128xf32>
    %198 = arith.mulf %186, %197 : vector<1x128xf32>
    %199 = arith.addf %195, %198 : vector<1x128xf32>
    %200 = math.tanh %199 : vector<1x128xf32>
    %201 = arith.subf %175, %200 : vector<1x128xf32>
    %202 = arith.mulf %194, %201 : vector<1x128xf32>
    %203 = arith.addf %200, %202 : vector<1x128xf32>
    %c6 = arith.constant 6 : index
    %c0_39 = arith.constant 0 : index
    %204 = vector.load %arg6[%c6, %c0_39] : memref<8x128xf32, #tpu.memory_space<vmem>>, vector<1x128xf32>
    tpu.vector_store %arg6[%c6, %c0_39], %203 {strides = array<i32>} : memref<8x128xf32, #tpu.memory_space<vmem>>, vector<1x128xf32>,
    %205 = vector.extract_strided_slice %5 {offsets = [7, 0], sizes = [1, 384], strides = [1, 1]} : vector<8x384xf32> to vector<1x384xf32>
    %cst_40 = arith.constant dense<0.000000e+00> : vector<1x384xf32>
    %206 = tpu.matmul %203, %6, %cst_40 {dimension_numbers = #tpu.dot_dimension_numbers<[1], [0], [0], [1], [0, 0, 1, 1], [], []>} : vector<1x128xf32>, vector<128x384xf32>, vector<1x384xf32> -> vector<1x384xf32>
    %207 = vector.extract_strided_slice %205 {offsets = [0, 0], sizes = [1, 128], strides = [1, 1]} : vector<1x384xf32> to vector<1x128xf32>
    %208 = vector.extract_strided_slice %206 {offsets = [0, 0], sizes = [1, 128], strides = [1, 1]} : vector<1x384xf32> to vector<1x128xf32>
    %209 = arith.addf %207, %208 : vector<1x128xf32>
    %210 = arith.negf %209 : vector<1x128xf32>
    %211 = math.exp %210 : vector<1x128xf32>
    %cst_41 = arith.constant 1.000000e+00 : f32
    %212 = vector.broadcast %cst_41 : f32 to vector<1x128xf32>
    %213 = arith.addf %212, %211 : vector<1x128xf32>
    %214 = arith.divf %212, %213 : vector<1x128xf32>
    %215 = vector.extract_strided_slice %205 {offsets = [0, 128], sizes = [1, 128], strides = [1, 1]} : vector<1x384xf32> to vector<1x128xf32>
    %216 = vector.extract_strided_slice %206 {offsets = [0, 128], sizes = [1, 128], strides = [1, 1]} : vector<1x384xf32> to vector<1x128xf32>
    %217 = arith.addf %215, %216 : vector<1x128xf32>
    %218 = arith.negf %217 : vector<1x128xf32>
    %219 = math.exp %218 : vector<1x128xf32>
    %cst_42 = arith.constant 1.000000e+00 : f32
    %220 = vector.broadcast %cst_42 : f32 to vector<1x128xf32>
    %221 = arith.addf %220, %219 : vector<1x128xf32>
    %222 = arith.divf %220, %221 : vector<1x128xf32>
    %223 = vector.extract_strided_slice %205 {offsets = [0, 256], sizes = [1, 128], strides = [1, 1]} : vector<1x384xf32> to vector<1x128xf32>
    %224 = vector.extract_strided_slice %206 {offsets = [0, 256], sizes = [1, 128], strides = [1, 1]} : vector<1x384xf32> to vector<1x128xf32>
    %225 = arith.addf %224, %7 : vector<1x128xf32>
    %226 = arith.mulf %214, %225 : vector<1x128xf32>
    %227 = arith.addf %223, %226 : vector<1x128xf32>
    %228 = math.tanh %227 : vector<1x128xf32>
    %229 = arith.subf %203, %228 : vector<1x128xf32>
    %230 = arith.mulf %222, %229 : vector<1x128xf32>
    %231 = arith.addf %228, %230 : vector<1x128xf32>
    %c7 = arith.constant 7 : index
    %c0_43 = arith.constant 0 : index
    %232 = vector.load %arg6[%c7, %c0_43] : memref<8x128xf32, #tpu.memory_space<vmem>>, vector<1x128xf32>
    tpu.vector_store %arg6[%c7, %c0_43], %231 {strides = array<i32>} : memref<8x128xf32, #tpu.memory_space<vmem>>, vector<1x128xf32>,
    %c0_44 = arith.constant 0 : index
    %c0_45 = arith.constant 0 : index
    %233 = vector.load %arg7[%c0_44, %c0_45] : memref<1x128xf32, #tpu.memory_space<vmem>>, vector<1x128xf32>
    tpu.vector_store %arg7[%c0_44, %c0_45], %231 {strides = array<i32>} : memref<1x128xf32, #tpu.memory_space<vmem>>, vector<1x128xf32>,
    return
  }
}

</mosaic_0001>

<bundles_post_ra>
// kernel: tpu_custom_call.1
= control target key start
LH: loop header
LB: loop body
LE: loop exit
PB: predicated region body
PF: predicated region fallthrough
CT: control target
= control target key end

     0   :  { %13 = vsyncpa [#allocation3], 0  ;;  %s3408_s0 = inlined_call_operand.hbm [shape: f32[8,128], index: 0, kind: input, shape index: {}]   ;;  %s3409_s1 = inlined_call_operand.hbm [shape: f32[128,384], index: 1, kind: input, shape index: {}]   ;;  %s3410_s2 = inlined_call_operand.hbm [shape: f32[128,384], index: 2, kind: input, shape index: {}]   ;;  %s3411_s3 = inlined_call_operand.vmem [shape: f32[1,384], index: 3, kind: input, shape index: {}]   ;;  %s3412_s4 = inlined_call_operand.vmem [shape: f32[1,128], index: 4, kind: input, shape index: {}]   ;;  %s3413_s5 = inlined_call_operand.vmem [shape: f32[1,128], index: 5, kind: input, shape index: {}]   ;;  %s3414_s6 = inlined_call_operand.hbm [shape: f32[8,128], index: 6, kind: output, shape index: {0}]   ;;  %s3415_s7 = inlined_call_operand.hbm [shape: f32[1,128], index: 7, kind: output, shape index: {1}]  }
   0x1   :  { %14 = vsyncpa [#allocation6], 0 }
   0x2   :  { %15 = vsyncpa [#allocation4], 0 }
   0x3   :  { %16 = vsyncpa [#allocation10], 0  ;;  %s2511_s24 = smov [#allocation5]  }
   0x4   :  { %s32_s25 = sshll.u32 %s2511_s24, 4  ;;  %s33_s25 = int_to_ptr.vmem [resolvable:$true] %s32_s25 }
   0x5   :  { %s2411_s26 = scalar_lea.vmem %s33_s25, 6144  ;;  %p2416_p1 = scmp.lt.s32.totalorder %s33_s25, %s33_s25 }
   0x6   :  { %p2412_p0 = scmp.ne.s32.totalorder %s33_s25, %s2411_s26  ;;  %p2417_p2 = scmp.lt.s32.totalorder %s2411_s26, %s2411_s26 }
   0x8   :  { %p2418_p3 = por %p2417_p2, %p2416_p1 }
   0xa   :  { %p2419_p4 = pnand %p2418_p3, %p2412_p0 }
   0xc   :  { %2422 = shalt.err (!%p2419_p4)
}
   0xd   :  { %s2512_s27 = smov 384   ;;  %s2513_s28 = smov 24  }
   0xe   :  { %38 = dma.hbm_to_vmem [thread:$0]  %s3409_s1, 6144, %s33_s25, [#allocation6], %s2512_s27, %s2512_s27, %s2513_s28  }
   0xf   :  { %s2514_s8 = smov [#allocation2]   ;;  %s2515_s10 = smov [#allocation7]  }
  0x10   :  { %s23_s9 = sshll.u32 %s2514_s8, 4  ;;  %s44_s11 = sshll.u32 %s2515_s10, 4  ;;  %s24_s9 = int_to_ptr.vmem [resolvable:$true] %s23_s9  ;;  %s45_s11 = int_to_ptr.vmem [resolvable:$true] %s44_s11 }
  0x11   :  { %s2431_s12 = scalar_lea.vmem %s24_s9, 128  ;;  %p2436_p6 = scmp.lt.s32.totalorder %s24_s9, %s24_s9 }
  0x12   :  { %p2432_p5 = scmp.ne.s32.totalorder %s24_s9, %s2431_s12  ;;  %p2437_p7 = scmp.lt.s32.totalorder %s2431_s12, %s2431_s12 }
  0x14   :  { %p2438_p8 = por %p2437_p7, %p2436_p6 }
  0x16   :  { %p2439_p9 = pnand %p2438_p8, %p2432_p5 }
  0x18   :  { %2442 = shalt.err (!%p2439_p9)
}
  0x19   :  { %26 = dma.hbm_to_vmem [thread:$0]  %s3408_s0, 128, %s24_s9, [#allocation3]  }
  0x1a   :  { %s2451_s15 = scalar_lea.vmem %s45_s11, 6144  ;;  %p2456_p11 = scmp.lt.s32.totalorder %s45_s11, %s45_s11 }
  0x1b   :  { %p2452_p10 = scmp.ne.s32.totalorder %s45_s11, %s2451_s15  ;;  %p2457_p12 = scmp.lt.s32.totalorder %s2451_s15, %s2451_s15 }
  0x1d   :  { %p2458_p13 = por %p2457_p12, %p2456_p11 }
  0x1f   :  { %p2459_p0 = pnand %p2458_p13, %p2452_p10 }
  0x21   :  { %2462 = shalt.err (!%p2459_p0)
}
  0x22   :  { %50 = dma.hbm_to_vmem [thread:$0]  %s3410_s2, 6144, %s45_s11, [#allocation6], %s2512_s27, %s2512_s27, %s2513_s28  }
  0x23   :  { %2503 = dma.done.wait [#allocation3], 128  }
  0x24   :  { %2504 = vsyncadd [#allocation3], 4294967168 }
  0x25   :  { %2505 = dma.done.wait [#allocation6], 12288  }
  0x26   :  { %2506 = vsyncadd [#allocation6], 4294955008  ;;  %v3416_v0 = vmov 0.0   ;;  %vm2517_vm0 = vmmov 0   ;;  %v113_v1 = vld [vmem:[#allocation5 + $0x170] sm:$0xff]  ;;  %v112_v2 = vld [vmem:[#allocation5 + $0x168] sm:$0xff] }
  0x27   :  { %1950 = vmatprep.subr.mxu1 %v3416_v0  ;;  %196 = vmatprep.mubr.f32.mxu0 %v3416_v0  ;;  %v110_v3 = vld [vmem:[#allocation5 + $0x158] sm:$0xff]  ;;  %v109_v4 = vld [vmem:[#allocation5 + $0x150] sm:$0xff]  ;;  %v107_v5 = vld [vmem:[#allocation5 + $0x140] sm:$0xff]  ;;  %s2519_s22 = smov [#allocation9]  }
  0x28   :  { %1982 = vmatprep.mubr.msk.f32.mxu1 %vm2517_vm0, %v3416_v0  ;;  %132 = vmatprep.subr.mxu0 %v113_v1  ;;  %v106_v6 = vld [vmem:[#allocation5 + $0x138] sm:$0xff]  ;;  %v104_v7 = vld [vmem:[#allocation5 + $0x128] sm:$0xff]  ;;  %v103_v8 = vld [vmem:[#allocation5 + $0x120] sm:$0xff]  ;;  %s1767_s23 = sshll.u32 %s2519_s22, 4  ;;  %s1768_s23 = int_to_ptr.vmem [resolvable:$true] %s1767_s23 }
  0x29   :  { %133 = vmatpush1.msra.mxu0 %v112_v2  ;;  %v101_v9 = vld [vmem:[#allocation5 + $0x110] sm:$0xff]  ;;  %v100_v10 = vld [vmem:[#allocation5 + $0x108] sm:$0xff]  ;;  %v98_v11 = vld [vmem:[#allocation5 + $0xf8] sm:$0xff] }
  0x2a   :  { %134 = vmatprep.subr.mxu0 %v110_v3  ;;  %v97_v12 = vld [vmem:[#allocation5 + $0xf0] sm:$0xff]  ;;  %v95_v13 = vld [vmem:[#allocation5 + $0xe0] sm:$0xff]  ;;  %v114_v14 = vld [vmem:[#allocation5 + $0x178] sm:$0xff] }
  0x2b   :  { %135 = vmatpush1.msra.mxu0 %v109_v4  ;;  %v94_v15 = vld [vmem:[#allocation5 + $0xd8] sm:$0xff]  ;;  %1951 = vmatpush3.msra.mxu1 %v114_v14  ;;  %v111_v16 = vld [vmem:[#allocation5 + $0x160] sm:$0xff]  ;;  %v92_v17 = vld [vmem:[#allocation5 + $0xc8] sm:$0xff] }
  0x2c   :  { %136 = vmatprep.subr.mxu0 %v107_v5  ;;  %1952 = vmatprep.subr.mxu1 %v3416_v0  ;;  %v108_v18 = vld [vmem:[#allocation5 + $0x148] sm:$0xff]  ;;  %v91_v19 = vld [vmem:[#allocation5 + $0xc0] sm:$0xff]  ;;  %v89_v20 = vld [vmem:[#allocation5 + $0xb0] sm:$0xff] }
  0x2d   :  { %137 = vmatpush1.msra.mxu0 %v106_v6  ;;  %1953 = vmatpush3.msra.mxu1 %v111_v16  ;;  %v105_v21 = vld [vmem:[#allocation5 + $0x130] sm:$0xff]  ;;  %v88_v22 = vld [vmem:[#allocation5 + $0xa8] sm:$0xff]  ;;  %v86_v23 = vld [vmem:[#allocation5 + $0x98] sm:$0xff] }
  0x2e   :  { %138 = vmatprep.subr.mxu0 %v104_v7  ;;  %1954 = vmatprep.subr.mxu1 %v3416_v0  ;;  %v102_v24 = vld [vmem:[#allocation5 + $0x118] sm:$0xff]  ;;  %v85_v25 = vld [vmem:[#allocation5 + $0x90] sm:$0xff]  ;;  %v83_v26 = vld [vmem:[#allocation5 + $0x80] sm:$0xff] }
  0x2f   :  { %139 = vmatpush1.msra.mxu0 %v103_v8  ;;  %1955 = vmatpush3.msra.mxu1 %v108_v18  ;;  %v99_v27 = vld [vmem:[#allocation5 + $0x100] sm:$0xff]  ;;  %v82_v28 = vld [vmem:[#allocation5 + $0x78] sm:$0xff]  ;;  %v80_v29 = vld [vmem:[#allocation5 + $0x68] sm:$0xff] }
  0x30   :  { %140 = vmatprep.subr.mxu0 %v101_v9  ;;  %1956 = vmatprep.subr.mxu1 %v3416_v0  ;;  %v96_v30 = vld [vmem:[#allocation5 + $0xe8] sm:$0xff]  ;;  %v79_v31 = vld [vmem:[#allocation5 + $0x60] sm:$0xff]  ;;  %v77_v32 = vld [vmem:[#allocation5 + $0x50] sm:$0xff] }
  0x31   :  { %141 = vmatpush1.msra.mxu0 %v100_v10  ;;  %1957 = vmatpush3.msra.mxu1 %v105_v21  ;;  %v93_v33 = vld [vmem:[#allocation5 + $0xd0] sm:$0xff]  ;;  %v76_v34 = vld [vmem:[#allocation5 + $0x48] sm:$0xff]  ;;  %v74_v35 = vld [vmem:[#allocation5 + $0x38] sm:$0xff] }
  0x32   :  { %142 = vmatprep.subr.mxu0 %v98_v11  ;;  %1958 = vmatprep.subr.mxu1 %v3416_v0  ;;  %v90_v36 = vld [vmem:[#allocation5 + $0xb8] sm:$0xff]  ;;  %v73_v37 = vld [vmem:[#allocation5 + $0x30] sm:$0xff]  ;;  %v71_v38 = vld [vmem:[#allocation5 + $0x20] sm:$0xff] }
  0x33   :  { %143 = vmatpush1.msra.mxu0 %v97_v12  ;;  %1959 = vmatpush3.msra.mxu1 %v102_v24  ;;  %v87_v39 = vld [vmem:[#allocation5 + $0xa0] sm:$0xff]  ;;  %v70_v40 = vld [vmem:[#allocation5 + $0x18] sm:$0xff]  ;;  %v68_v41 = vld [vmem:[#allocation5 + $0x8] sm:$0xff] }
  0x34   :  { %144 = vmatprep.subr.mxu0 %v95_v13  ;;  %1960 = vmatprep.subr.mxu1 %v3416_v0  ;;  %v84_v42 = vld [vmem:[#allocation5 + $0x88] sm:$0xff]  ;;  %v67_v43 = vld [vmem:[#allocation5] sm:$0xff]  ;;  %v66_v44 = vld [vmem:[#allocation2] sm:$0xff] }
  0x35   :  { %145 = vmatpush1.msra.mxu0 %v94_v15  ;;  %1961 = vmatpush3.msra.mxu1 %v99_v27  ;;  %v2582_v45 = vld [vmem:[#allocation7 + $0x170] sm:$0xff]  ;;  %v2585_v46 = vld [vmem:[#allocation7 + $0x168] sm:$0xff]  ;;  %v2587_v48 = vld [vmem:[#allocation7 + $0x158] sm:$0xff] }
  0x36   :  { %146 = vmatprep.subr.mxu0 %v92_v17  ;;  %1962 = vmatprep.subr.mxu1 %v3416_v0  ;;  %3435 = vst [vmem:[#allocation15_spill] sm:$0xff] %v2582_v45  ;;  %v81_v47 = vld [vmem:[#allocation5 + $0x70] sm:$0xff]  ;;  %v78_v50 = vld [vmem:[#allocation5 + $0x58] sm:$0xff]  ;;  %v2594_v51 = vld [vmem:[#allocation7 + $0x140] sm:$0xff] }
  0x37   :  { %147 = vmatpush1.msra.mxu0 %v91_v19  ;;  %1963 = vmatpush3.msra.mxu1 %v96_v30  ;;  %v2591_v49 = vld [vmem:[#allocation7 + $0x150] sm:$0xff]  ;;  %v2597_v52 = vld [vmem:[#allocation7 + $0x138] sm:$0xff]  ;;  %v75_v53 = vld [vmem:[#allocation5 + $0x40] sm:$0xff] }
  0x38   :  { %148 = vmatprep.subr.mxu0 %v89_v20  ;;  %1964 = vmatprep.subr.mxu1 %v3416_v0  ;;  %v2601_v54 = vld [vmem:[#allocation7 + $0x128] sm:$0xff]  ;;  %v2604_v55 = vld [vmem:[#allocation7 + $0x120] sm:$0xff]  ;;  %v2608_v57 = vld [vmem:[#allocation7 + $0x110] sm:$0xff] }
  0x39   :  { %149 = vmatpush1.msra.mxu0 %v88_v22  ;;  %1965 = vmatpush3.msra.mxu1 %v93_v33  ;;  %v72_v56 = vld [vmem:[#allocation5 + $0x28] sm:$0xff]  ;;  %v69_v59 = vld [vmem:[#allocation5 + $0x10] sm:$0xff]  ;;  %v2615_v60 = vld [vmem:[#allocation7 + $0xf8] sm:$0xff] }
  0x3a   :  { %150 = vmatprep.subr.mxu0 %v86_v23  ;;  %1966 = vmatprep.subr.mxu1 %v3416_v0  ;;  %v2611_v58 = vld [vmem:[#allocation7 + $0x108] sm:$0xff]  ;;  %v2618_v61 = vld [vmem:[#allocation7 + $0xf0] sm:$0xff]  ;;  %v2622_v62 = vld [vmem:[#allocation7 + $0xe0] sm:$0xff] }
  0x3b   :  { %151 = vmatpush1.msra.mxu0 %v85_v25  ;;  %1967 = vmatpush3.msra.mxu1 %v90_v36  ;;  %v2625_v63 = vld [vmem:[#allocation7 + $0xd8] sm:$0xff]  ;;  %v2631_v2 = vld [vmem:[#allocation7 + $0xc8] sm:$0xff]  ;;  %v2634_v3 = vld [vmem:[#allocation7 + $0xc0] sm:$0xff] }
  0x3c   :  { %152 = vmatprep.subr.mxu0 %v83_v26  ;;  %1968 = vmatprep.subr.mxu1 %v3416_v0  ;;  %v2628_v1 = vld [vmem:[#allocation7 + $0x178] sm:$0xff]  ;;  %v2637_v4 = vld [vmem:[#allocation7 + $0x160] sm:$0xff]  ;;  %v2640_v5 = vld [vmem:[#allocation7 + $0xb0] sm:$0xff] }
  0x3d   :  { %153 = vmatpush1.msra.mxu0 %v82_v28  ;;  %1969 = vmatpush3.msra.mxu1 %v87_v39  ;;  %v2644_v6 = vld [vmem:[#allocation7 + $0xa8] sm:$0xff]  ;;  %v2650_v8 = vld [vmem:[#allocation7 + $0x98] sm:$0xff]  ;;  %v2654_v9 = vld [vmem:[#allocation7 + $0x90] sm:$0xff] }
  0x3e   :  { %154 = vmatprep.subr.mxu0 %v80_v29  ;;  %1970 = vmatprep.subr.mxu1 %v3416_v0  ;;  %v2647_v7 = vld [vmem:[#allocation7 + $0x148] sm:$0xff]  ;;  %v2657_v10 = vld [vmem:[#allocation7 + $0x130] sm:$0xff]  ;;  %v2660_v11 = vld [vmem:[#allocation7 + $0x80] sm:$0xff] }
  0x3f   :  { %155 = vmatpush1.msra.mxu0 %v79_v31  ;;  %1971 = vmatpush3.msra.mxu1 %v84_v42  ;;  %v2664_v12 = vld [vmem:[#allocation7 + $0x78] sm:$0xff]  ;;  %v2670_v14 = vld [vmem:[#allocation7 + $0x68] sm:$0xff]  ;;  %v2674_v15 = vld [vmem:[#allocation7 + $0x60] sm:$0xff] }
  0x40   :  { %156 = vmatprep.subr.mxu0 %v77_v32  ;;  %1972 = vmatprep.subr.mxu1 %v3416_v0  ;;  %v2667_v13 = vld [vmem:[#allocation7 + $0x118] sm:$0xff]  ;;  %v2677_v16 = vld [vmem:[#allocation7 + $0x100] sm:$0xff]  ;;  %v2680_v17 = vld [vmem:[#allocation7 + $0x50] sm:$0xff] }
  0x41   :  { %157 = vmatpush1.msra.mxu0 %v76_v34  ;;  %1973 = vmatpush3.msra.mxu1 %v81_v47  ;;  %v2684_v18 = vld [vmem:[#allocation7 + $0x48] sm:$0xff]  ;;  %v2690_v20 = vld [vmem:[#allocation7 + $0x38] sm:$0xff]  ;;  %v2694_v21 = vld [vmem:[#allocation7 + $0x30] sm:$0xff] }
  0x42   :  { %158 = vmatprep.subr.mxu0 %v74_v35  ;;  %1974 = vmatprep.subr.mxu1 %v3416_v0  ;;  %v2687_v19 = vld [vmem:[#allocation7 + $0xe8] sm:$0xff]  ;;  %v2697_v22 = vld [vmem:[#allocation7 + $0xd0] sm:$0xff]  ;;  %v2700_v23 = vld [vmem:[#allocation7 + $0x20] sm:$0xff] }
  0x43   :  { %159 = vmatpush1.msra.mxu0 %v73_v37  ;;  %1975 = vmatpush3.msra.mxu1 %v78_v50  ;;  %v2704_v24 = vld [vmem:[#allocation7 + $0x18] sm:$0xff]  ;;  %v2710_v26 = vld [vmem:[#allocation7 + $0x8] sm:$0xff]  ;;  %v2714_v27 = vld [vmem:[#allocation7] sm:$0xff] }
  0x44   :  { %160 = vmatprep.subr.mxu0 %v71_v38  ;;  %1976 = vmatprep.subr.mxu1 %v3416_v0  ;;  %3436 = vst [vmem:[#allocation16_spill] sm:$0xff] %v2704_v24  ;;  %v2707_v25 = vld [vmem:[#allocation7 + $0xb8] sm:$0xff]  ;;  %3437 = vst [vmem:[#allocation17_spill] sm:$0xff] %v2710_v26  ;;  %v2717_v28 = vld [vmem:[#allocation7 + $0xa0] sm:$0xff]  ;;  %v117_v38 = vlaneseq }
  0x45   :  { %161 = vmatpush1.msra.mxu0 %v70_v40  ;;  %1977 = vmatpush3.msra.mxu1 %v75_v53  ;;  %3438 = vst [vmem:[#allocation18_spill] sm:$0xff] %v2714_v27  ;;  %v2723_v29 = vld [vmem:[%s3413_s5] sm:$0x1]  ;;  %v2728_v30 = vld [vmem:[#allocation7 + $0x88] sm:$0xff]  ;;  %v2734_v31 = vld [vmem:[#allocation7 + $0x70] sm:$0xff] }
  0x46   :  { %162 = vmatprep.subr.mxu0 %v68_v41  ;;  %1978 = vmatprep.subr.mxu1 %v3416_v0  ;;  %v2740_v32 = vld [vmem:[#allocation7 + $0x58] sm:$0xff]  ;;  %v2746_v33 = vld [vmem:[#allocation7 + $0x40] sm:$0xff]  ;;  %v2752_v34 = vld [vmem:[#allocation7 + $0x28] sm:$0xff]  ;;  %v118_v39 = vshrl.u32 %v117_v38, 7 }
  0x47   :  { %163 = vmatpush1.msra.mxu0 %v67_v43  ;;  %1979 = vmatpush3.msra.mxu1 %v72_v56  ;;  %3439 = vst [vmem:[#allocation19_spill] sm:$0xff] %v2752_v34  ;;  %v2758_v35 = vld [vmem:[#allocation7 + $0x10] sm:$0xff]  ;;  %v115_v41 = vld [vmem:[%s3411_s3] sm:$0x7] }
  0x48   :  { %197 = vmatmul.mubr.f32.vlgmr.msra.gmra.mxu0 %v66_v44  ;;  %323 = vmatprep.subr.mxu0 %v2582_v45  ;;  %3440 = vst [vmem:[#allocation20_spill] sm:$0xff] %v2758_v35  ;;  %v119_v40 = vsub.s32 0, %v118_v39  ;;  %v123_v56 = vsub.s32 1, %v118_v39 }
  0x49   :  { %324 = vmatpush1.msra.mxu0 %v2585_v46  ;;  %1980 = vmatprep.subr.mxu1 %v3416_v0 }
  0x4a   :  { %325 = vmatprep.subr.mxu0 %v2587_v48  ;;  %1981 = vmatpush3.msra.mxu1 %v69_v59  ;;  %v120_v43 = vrot.slane %v115_v41, %v119_v40 }
  0x4b   :  { %326 = vmatpush1.msra.mxu0 %v2591_v49  ;;  %1985 = vmatprep.subr.mxu1 %v3416_v0 }
  0x4c   :  { %327 = vmatprep.subr.mxu0 %v2594_v51  ;;  %1983 = vmatmul.mubr.f32.vlgmr.msra.gmra.mxu1 %v66_v44 }
  0x4d   :  { %328 = vmatpush1.msra.mxu0 %v2597_v52  ;;  %387 = vmatprep.mubr.f32.mxu0 %v3416_v0 }
  0x4e   :  { %329 = vmatprep.subr.mxu0 %v2601_v54  ;;  %1986 = vmatpush3.msra.mxu1 %v2628_v1 }
  0x4f   :  { %330 = vmatpush1.msra.mxu0 %v2604_v55  ;;  %1987 = vmatprep.subr.mxu1 %v3416_v0 }
  0x50   :  { %331 = vmatprep.subr.mxu0 %v2608_v57  ;;  %1988 = vmatpush3.msra.mxu1 %v2637_v4 }
  0x51   :  { %332 = vmatpush1.msra.mxu0 %v2611_v58  ;;  %1989 = vmatprep.subr.mxu1 %v3416_v0 }
  0x52   :  { %333 = vmatprep.subr.mxu0 %v2615_v60  ;;  %1990 = vmatpush3.msra.mxu1 %v2647_v7 }
  0x53   :  { %334 = vmatpush1.msra.mxu0 %v2618_v61  ;;  %1991 = vmatprep.subr.mxu1 %v3416_v0 }
  0x54   :  { %335 = vmatprep.subr.mxu0 %v2622_v62  ;;  %1992 = vmatpush3.msra.mxu1 %v2657_v10 }
  0x55   :  { %336 = vmatpush1.msra.mxu0 %v2625_v63  ;;  %1993 = vmatprep.subr.mxu1 %v3416_v0 }
  0x56   :  { %337 = vmatprep.subr.mxu0 %v2631_v2  ;;  %1994 = vmatpush3.msra.mxu1 %v2667_v13 }
  0x57   :  { %338 = vmatpush1.msra.mxu0 %v2634_v3  ;;  %1995 = vmatprep.subr.mxu1 %v3416_v0 }
  0x58   :  { %339 = vmatprep.subr.mxu0 %v2640_v5  ;;  %1996 = vmatpush3.msra.mxu1 %v2677_v16 }
  0x59   :  { %340 = vmatpush1.msra.mxu0 %v2644_v6  ;;  %1997 = vmatprep.subr.mxu1 %v3416_v0 }
  0x5a   :  { %341 = vmatprep.subr.mxu0 %v2650_v8  ;;  %1998 = vmatpush3.msra.mxu1 %v2687_v19 }
  0x5b   :  { %342 = vmatpush1.msra.mxu0 %v2654_v9  ;;  %1999 = vmatprep.subr.mxu1 %v3416_v0 }
  0x5c   :  { %343 = vmatprep.subr.mxu0 %v2660_v11  ;;  %2000 = vmatpush3.msra.mxu1 %v2697_v22 }
  0x5d   :  { %344 = vmatpush1.msra.mxu0 %v2664_v12  ;;  %2001 = vmatprep.subr.mxu1 %v3416_v0 }
  0x5e   :  { %345 = vmatprep.subr.mxu0 %v2670_v14  ;;  %2002 = vmatpush3.msra.mxu1 %v2707_v25 }
  0x5f   :  { %346 = vmatpush1.msra.mxu0 %v2674_v15  ;;  %2003 = vmatprep.subr.mxu1 %v3416_v0 }
  0x60   :  { %347 = vmatprep.subr.mxu0 %v2680_v17  ;;  %2004 = vmatpush3.msra.mxu1 %v2717_v28 }
  0x61   :  { %348 = vmatpush1.msra.mxu0 %v2684_v18  ;;  %2005 = vmatprep.subr.mxu1 %v3416_v0 }
  0x62   :  { %349 = vmatprep.subr.mxu0 %v2690_v20  ;;  %2006 = vmatpush3.msra.mxu1 %v2728_v30 }
  0x63   :  { %350 = vmatpush1.msra.mxu0 %v2694_v21  ;;  %2017 = vmatprep.mubr.msk.f32.mxu1 %vm2517_vm0, %v3416_v0 }
  0x64   :  { %351 = vmatprep.subr.mxu0 %v2700_v23  ;;  %2007 = vmatprep.subr.mxu1 %v3416_v0 }
  0x65   :  { %352 = vmatpush1.msra.mxu0 %v2704_v24  ;;  %2008 = vmatpush3.msra.mxu1 %v2734_v31 }
  0x66   :  { %353 = vmatprep.subr.mxu0 %v2710_v26  ;;  %2009 = vmatprep.subr.mxu1 %v3416_v0 }
  0x67   :  { %354 = vmatpush1.msra.mxu0 %v2714_v27  ;;  %2010 = vmatpush3.msra.mxu1 %v2740_v32 }
  0x68   :  { %388 = vmatmul.mubr.f32.vlgmr.msra.gmra.mxu0 %v2723_v29  ;;  %486 = vmatprep.subr.mxu0 %v2582_v45 }
  0x69   :  { %487 = vmatpush1.msra.mxu0 %v2585_v46  ;;  %2011 = vmatprep.subr.mxu1 %v3416_v0 }
  0x6a   :  { %488 = vmatprep.subr.mxu0 %v2587_v48  ;;  %2012 = vmatpush3.msra.mxu1 %v2746_v33 }
  0x6b   :  { %489 = vmatpush1.msra.mxu0 %v2591_v49  ;;  %2013 = vmatprep.subr.mxu1 %v3416_v0 }
  0x6c   :  { %490 = vmatprep.subr.mxu0 %v2594_v51  ;;  %2014 = vmatpush3.msra.mxu1 %v2752_v34 }
  0x6d   :  { %491 = vmatpush1.msra.mxu0 %v2597_v52  ;;  %2015 = vmatprep.subr.mxu1 %v3416_v0 }
  0x6e   :  { %492 = vmatprep.subr.mxu0 %v2601_v54  ;;  %2016 = vmatpush3.msra.mxu1 %v2758_v35 }
  0x6f   :  { %493 = vmatpush1.msra.mxu0 %v2604_v55  ;;  %2018 = vmatmul.mubr.f32.vlgmr.msra.gmra.mxu1 %v2723_v29 }
  0x70   :  { %494 = vmatprep.subr.mxu0 %v2608_v57  ;;  %2020 = vmatprep.subr.mxu1 %v3416_v0 }
  0x71   :  { %495 = vmatpush1.msra.mxu0 %v2611_v58  ;;  %2021 = vmatpush3.msra.mxu1 %v2628_v1 }
  0x72   :  { %496 = vmatprep.subr.mxu0 %v2615_v60  ;;  %2022 = vmatprep.subr.mxu1 %v3416_v0 }
  0x73   :  { %497 = vmatpush1.msra.mxu0 %v2618_v61  ;;  %2023 = vmatpush3.msra.mxu1 %v2637_v4 }
  0x74   :  { %498 = vmatprep.subr.mxu0 %v2622_v62  ;;  %2024 = vmatprep.subr.mxu1 %v3416_v0 }
  0x75   :  { %499 = vmatpush1.msra.mxu0 %v2625_v63  ;;  %2025 = vmatpush3.msra.mxu1 %v2647_v7 }
  0x76   :  { %500 = vmatprep.subr.mxu0 %v2631_v2  ;;  %2026 = vmatprep.subr.mxu1 %v3416_v0 }
  0x77   :  { %501 = vmatpush1.msra.mxu0 %v2634_v3  ;;  %2027 = vmatpush3.msra.mxu1 %v2657_v10 }
  0x78   :  { %502 = vmatprep.subr.mxu0 %v2640_v5  ;;  %2028 = vmatprep.subr.mxu1 %v3416_v0 }
  0x79   :  { %503 = vmatpush1.msra.mxu0 %v2644_v6  ;;  %2029 = vmatpush3.msra.mxu1 %v2667_v13 }
  0x7a   :  { %504 = vmatprep.subr.mxu0 %v2650_v8  ;;  %2030 = vmatprep.subr.mxu1 %v3416_v0 }
  0x7b   :  { %505 = vmatpush1.msra.mxu0 %v2654_v9  ;;  %2031 = vmatpush3.msra.mxu1 %v2677_v16 }
  0x7c   :  { %506 = vmatprep.subr.mxu0 %v2660_v11  ;;  %2032 = vmatprep.subr.mxu1 %v3416_v0 }
  0x7d   :  { %507 = vmatpush1.msra.mxu0 %v2664_v12  ;;  %2033 = vmatpush3.msra.mxu1 %v2687_v19 }
  0x7e   :  { %508 = vmatprep.subr.mxu0 %v2670_v14  ;;  %2034 = vmatprep.subr.mxu1 %v3416_v0 }
  0x7f   :  { %509 = vmatpush1.msra.mxu0 %v2674_v15  ;;  %2035 = vmatpush3.msra.mxu1 %v2697_v22 }
  0x80   :  { %510 = vmatprep.subr.mxu0 %v2680_v17  ;;  %2036 = vmatprep.subr.mxu1 %v3416_v0 }
  0x81   :  { %511 = vmatpush1.msra.mxu0 %v2684_v18  ;;  %2037 = vmatpush3.msra.mxu1 %v2707_v25 }
  0x82   :  { %512 = vmatprep.subr.mxu0 %v2690_v20  ;;  %2038 = vmatprep.subr.mxu1 %v3416_v0 }
  0x83   :  { %513 = vmatpush1.msra.mxu0 %v2694_v21  ;;  %2039 = vmatpush3.msra.mxu1 %v2717_v28 }
  0x84   :  { %514 = vmatprep.subr.mxu0 %v2700_v23  ;;  %2040 = vmatprep.subr.mxu1 %v3416_v0 }
  0x85   :  { %515 = vmatpush1.msra.mxu0 %v2704_v24  ;;  %2041 = vmatpush3.msra.mxu1 %v2728_v30 }
  0x86   :  { %516 = vmatprep.subr.mxu0 %v2710_v26  ;;  %2042 = vmatprep.subr.mxu1 %v3416_v0 }
  0x87   :  { %517 = vmatpush1.msra.mxu0 %v2714_v27  ;;  %2043 = vmatpush3.msra.mxu1 %v2734_v31 }
  0x88   :  { %550 = vmatprep.mubr.f32.mxu0 %v3416_v0  ;;  %2044 = vmatprep.subr.mxu1 %v3416_v0 }
  0x89   :  { %2052 = vmatprep.mubr.msk.f32.mxu1 %vm2517_vm0, %v3416_v0  ;;  %2045 = vmatpush3.msra.mxu1 %v2740_v32 }
  0x8a   :  { %667 = vmatprep.subr.mxu0 %v2582_v45  ;;  %2046 = vmatprep.subr.mxu1 %v3416_v0 }
  0x8b   :  { %2047 = vmatpush3.msra.mxu1 %v2746_v33 }
  0x8c   :  { %2048 = vmatprep.subr.mxu1 %v3416_v0 }
  0x8d   :  { %2049 = vmatpush3.msra.mxu1 %v2752_v34 }
  0x8e   :  { %2050 = vmatprep.subr.mxu1 %v3416_v0 }
  0x8f   :  { %2051 = vmatpush3.msra.mxu1 %v2758_v35 }
  0x90   :  { %2055 = vmatprep.subr.mxu1 %v3416_v0  ;;  %v124_v0 = vrot.slane %v115_v41, %v123_v56 }
 0x108   :  { %v198_v42 = vpop.f32.mrf.mxu0 }
 0x109   :  { %v2830_v47 = vadd.f32 %v198_v42, %v120_v43  ;;  %v127_v42 = vsub.s32 2, %v118_v39  ;;  %v2839_v43 = vld [vmem:[%s3412_s4] sm:$0x1] }
 0x10a   :  { %v200_v44 = vpop.f32.mrf.mxu0 }
 0x10b   :  { %v2833_v45 = vadd.f32 %v200_v44, %v124_v0 }
 0x10c   :  { %v269_v36 = vpop.f32.mrf.mxu1 }
 0x10e   :  { %v1984_v37 = vpop.f32.mrf.mxu1 }
 0x128   :  { %v389_v50 = vpop.f32.mrf.mxu0 }
 0x129   :  { %v464_v53 = vadd.f32 %v389_v50, %v2830_v47  ;;  %v128_v50 = vrot.slane %v115_v41, %v127_v42  ;;  %v3444_v41 = vld [vmem:[#allocation18_spill] sm:$0xff]  ;;  %v3445_v42 = vld [vmem:[#allocation20_spill] sm:$0xff] }
 0x12a   :  { %v391_v37 = vpop.f32.mrf.mxu0 }
 0x12b   :  { %v1781_v59 = vmul.f32 -1.442695, %v464_v53  ;;  %v471_v38 = vadd.f32 %v391_v37, %v2833_v45  ;;  %v2842_v56 = vadd.f32 %v269_v36, %v128_v50  ;;  %v3443_v36 = vld [vmem:[#allocation17_spill] sm:$0xff]  ;;  %v3446_v50 = vld [vmem:[#allocation15_spill] sm:$0xff] }
 0x12d   :  { %2274 = vpow2.f32 %v1781_v59  ;;  %v1782_v26 = vmul.f32 -1.442695, %v471_v38 }
 0x12f   :  { %v460_v35 = vpop.f32.mrf.mxu1  ;;  %2276 = vpow2.f32 %v1782_v26 }
 0x130   :  { %v478_v53 = vadd.f32 %v460_v35, %v2839_v43  ;;  %v3441_v35 = vmov 0.0  }
 0x131   :  { %v2019_v27 = vpop.f32.mrf.mxu1 }
 0x13a   :  { %v2275_v34 = vpop.eup %2274 }
 0x13b   :  { %v468_v40 = vadd.f32 1.0, %v2275_v34 }
 0x13c   :  { %v2277_v0 = vpop.eup %2276 }
 0x13d   :  { %2278 = vrcp.f32 %v468_v40  ;;  %v475_v27 = vadd.f32 1.0, %v2277_v0 }
 0x14a   :  { %v2279_v44 = vpop.eup %2278 }
 0x14b   :  { %v479_v59 = vmul.f32 %v2279_v44, %v478_v53 }
 0x14d   :  { %v480_v37 = vadd.f32 %v479_v59, %v2842_v56 }
 0x14f   :  { %2280 = vtanh.f32 %v480_v37 }
 0x150   :  { %2282 = vrcp.f32 %v475_v27 }
 0x15c   :  { %v2281_v26 = vpop.eup %2280 }
 0x15d   :  { %v482_v34 = vsub.f32 %v2723_v29, %v2281_v26  ;;  %v2283_v39 = vpop.eup %2282  ;;  %v3442_v29 = vld [vmem:[#allocation19_spill] sm:$0xff] }
 0x15f   :  { %v483_v38 = vmul.f32 %v2283_v39, %v482_v34 }
 0x161   :  { %v2846_v40 = vadd.f32 %v2281_v26, %v483_v38 }
 0x163   :  { %485 = vst [vmem:[#allocation8] sm:$0x1] %v2846_v40  ;;  %551 = vmatmul.mubr.f32.vlgmr.msra.gmra.mxu0 %v2846_v40  ;;  %2053 = vmatmul.mubr.f32.vlgmr.msra.gmra.mxu1 %v2846_v40 }
 0x164   :  { %668 = vmatpush1.msra.mxu0 %v2585_v46  ;;  %2056 = vmatpush3.msra.mxu1 %v2628_v1 }
 0x165   :  { %669 = vmatprep.subr.mxu0 %v2587_v48  ;;  %2057 = vmatprep.subr.mxu1 %v3441_v35 }
 0x166   :  { %670 = vmatpush1.msra.mxu0 %v2591_v49  ;;  %2058 = vmatpush3.msra.mxu1 %v2637_v4 }
 0x167   :  { %671 = vmatprep.subr.mxu0 %v2594_v51  ;;  %2059 = vmatprep.subr.mxu1 %v3441_v35 }
 0x168   :  { %672 = vmatpush1.msra.mxu0 %v2597_v52  ;;  %2060 = vmatpush3.msra.mxu1 %v2647_v7 }
 0x169   :  { %673 = vmatprep.subr.mxu0 %v2601_v54  ;;  %2061 = vmatprep.subr.mxu1 %v3441_v35 }
 0x16a   :  { %674 = vmatpush1.msra.mxu0 %v2604_v55  ;;  %2062 = vmatpush3.msra.mxu1 %v2657_v10 }
 0x16b   :  { %675 = vmatprep.subr.mxu0 %v2608_v57  ;;  %2063 = vmatprep.subr.mxu1 %v3441_v35 }
 0x16c   :  { %676 = vmatpush1.msra.mxu0 %v2611_v58  ;;  %2064 = vmatpush3.msra.mxu1 %v2667_v13 }
 0x16d   :  { %677 = vmatprep.subr.mxu0 %v2615_v60  ;;  %2065 = vmatprep.subr.mxu1 %v3441_v35 }
 0x16e   :  { %678 = vmatpush1.msra.mxu0 %v2618_v61  ;;  %2066 = vmatpush3.msra.mxu1 %v2677_v16 }
 0x16f   :  { %679 = vmatprep.subr.mxu0 %v2622_v62  ;;  %2067 = vmatprep.subr.mxu1 %v3441_v35 }
 0x170   :  { %680 = vmatpush1.msra.mxu0 %v2625_v63  ;;  %2068 = vmatpush3.msra.mxu1 %v2687_v19 }
 0x171   :  { %681 = vmatprep.subr.mxu0 %v2631_v2  ;;  %2069 = vmatprep.subr.mxu1 %v3441_v35 }
 0x172   :  { %682 = vmatpush1.msra.mxu0 %v2634_v3  ;;  %2070 = vmatpush3.msra.mxu1 %v2697_v22 }
 0x173   :  { %683 = vmatprep.subr.mxu0 %v2640_v5  ;;  %2071 = vmatprep.subr.mxu1 %v3441_v35 }
 0x174   :  { %684 = vmatpush1.msra.mxu0 %v2644_v6  ;;  %2072 = vmatpush3.msra.mxu1 %v2707_v25 }
 0x175   :  { %685 = vmatprep.subr.mxu0 %v2650_v8  ;;  %2073 = vmatprep.subr.mxu1 %v3441_v35 }
 0x176   :  { %686 = vmatpush1.msra.mxu0 %v2654_v9  ;;  %2074 = vmatpush3.msra.mxu1 %v2717_v28 }
 0x177   :  { %687 = vmatprep.subr.mxu0 %v2660_v11  ;;  %2075 = vmatprep.subr.mxu1 %v3441_v35 }
 0x178   :  { %688 = vmatpush1.msra.mxu0 %v2664_v12  ;;  %2076 = vmatpush3.msra.mxu1 %v2728_v30 }
 0x179   :  { %689 = vmatprep.subr.mxu0 %v2670_v14  ;;  %2077 = vmatprep.subr.mxu1 %v3441_v35 }
 0x17a   :  { %690 = vmatpush1.msra.mxu0 %v2674_v15  ;;  %2078 = vmatpush3.msra.mxu1 %v2734_v31 }
 0x17b   :  { %691 = vmatprep.subr.mxu0 %v2680_v17  ;;  %2079 = vmatprep.subr.mxu1 %v3441_v35 }
 0x17c   :  { %692 = vmatpush1.msra.mxu0 %v2684_v18  ;;  %2080 = vmatpush3.msra.mxu1 %v2740_v32 }
 0x17d   :  { %693 = vmatprep.subr.mxu0 %v2690_v20  ;;  %2081 = vmatprep.subr.mxu1 %v3441_v35 }
 0x17e   :  { %694 = vmatpush1.msra.mxu0 %v2694_v21  ;;  %2082 = vmatpush3.msra.mxu1 %v2746_v33 }
 0x17f   :  { %695 = vmatprep.subr.mxu0 %v2700_v23  ;;  %2083 = vmatprep.subr.mxu1 %v3441_v35 }
 0x180   :  { %696 = vmatpush1.msra.mxu0 %v2704_v24  ;;  %2084 = vmatpush3.msra.mxu1 %v3442_v29 }
 0x181   :  { %697 = vmatprep.subr.mxu0 %v3443_v36  ;;  %2085 = vmatprep.subr.mxu1 %v3441_v35 }
 0x182   :  { %698 = vmatpush1.msra.mxu0 %v3444_v41  ;;  %731 = vmatprep.mubr.f32.mxu0 %v3441_v35 }
 0x183   :  { %2086 = vmatpush3.msra.mxu1 %v3445_v42  ;;  %2087 = vmatprep.mubr.msk.f32.mxu1 %vm2517_vm0, %v3441_v35 }
 0x184   :  { %848 = vmatprep.subr.mxu0 %v3446_v50  ;;  %2090 = vmatprep.subr.mxu1 %v3441_v35 }
 0x223   :  { %v552_v53 = vpop.f32.mrf.mxu0  ;;  %v623_v0 = vpop.f32.mrf.mxu1 }
 0x224   :  { %v628_v44 = vrot.slane %v552_v53, 7  ;;  %v647_v50 = vadd.f32 %v623_v0, %v2839_v43  ;;  %v3452_v0 = vld [vmem:[#allocation15_spill] sm:$0xff] }
 0x225   :  { %v2054_v59 = vpop.f32.mrf.mxu1  ;;  %v554_v26 = vpop.f32.mrf.mxu0 }
 0x226   :  { %v630_v27 = vadd.f32 %v628_v44, %v2830_v47  ;;  %v638_v34 = vrot.slane %v554_v26, 7  ;;  %v649_v36 = vrot.slane %v647_v50, 7  ;;  %v3451_v50 = vld [vmem:[#allocation20_spill] sm:$0xff] }
 0x228   :  { %v1783_v37 = vmul.f32 -1.442695, %v630_v27  ;;  %v640_v39 = vadd.f32 %v638_v34, %v2833_v45 }
 0x22a   :  { %2284 = vpow2.f32 %v1783_v37  ;;  %v1784_v41 = vmul.f32 -1.442695, %v640_v39 }
 0x237   :  { %v2285_v38 = vpop.eup %2284 }
 0x238   :  { %v634_v42 = vadd.f32 1.0, %v2285_v38 }
 0x23a   :  { %2286 = vrcp.f32 %v634_v42 }
 0x23b   :  { %2288 = vpow2.f32 %v1784_v41 }
 0x247   :  { %v2287_v29 = vpop.eup %2286 }
 0x248   :  { %v651_v24 = vmul.f32 %v2287_v29, %v649_v36  ;;  %v2289_v59 = vpop.eup %2288  ;;  %v3449_v29 = vld [vmem:[#allocation17_spill] sm:$0xff]  ;;  %v3450_v36 = vld [vmem:[#allocation18_spill] sm:$0xff] }
 0x249   :  { %v644_v44 = vadd.f32 1.0, %v2289_v59 }
 0x24a   :  { %v652_v53 = vadd.f32 %v651_v24, %v2842_v56  ;;  %v3447_v24 = vld [vmem:[#allocation16_spill] sm:$0xff] }
 0x24c   :  { %2290 = vtanh.f32 %v652_v53 }
 0x24d   :  { %2292 = vrcp.f32 %v644_v44 }
 0x259   :  { %v2291_v27 = vpop.eup %2290 }
 0x25a   :  { %v655_v37 = vrot.slane %v2291_v27, 1  ;;  %v2293_v38 = vpop.eup %2292 }
 0x25c   :  { %v657_v26 = vsub.f32 %v2846_v40, %v655_v37  ;;  %v3448_v40 = vld [vmem:[#allocation19_spill] sm:$0xff] }
 0x25e   :  { %v659_v34 = vrot.slane %v657_v26, 7 }
 0x260   :  { %v661_v42 = vmul.f32 %v2293_v38, %v659_v34 }
 0x262   :  { %v2923_v39 = vadd.f32 %v2291_v27, %v661_v42 }
 0x264   :  { %663 = vst [vmem:[#allocation8] sm:$0x2] %v2923_v39  ;;  %v665_v41 = vrot.slane %v2923_v39, 1 }
 0x266   :  { %732 = vmatmul.mubr.f32.vlgmr.msra.gmra.mxu0 %v665_v41  ;;  %2088 = vmatmul.mubr.f32.vlgmr.msra.gmra.mxu1 %v665_v41 }
 0x267   :  { %849 = vmatpush1.msra.mxu0 %v2585_v46  ;;  %2091 = vmatpush3.msra.mxu1 %v2628_v1 }
 0x268   :  { %850 = vmatprep.subr.mxu0 %v2587_v48  ;;  %2092 = vmatprep.subr.mxu1 %v3441_v35 }
 0x269   :  { %851 = vmatpush1.msra.mxu0 %v2591_v49  ;;  %2093 = vmatpush3.msra.mxu1 %v2637_v4 }
 0x26a   :  { %852 = vmatprep.subr.mxu0 %v2594_v51  ;;  %2094 = vmatprep.subr.mxu1 %v3441_v35 }
 0x26b   :  { %853 = vmatpush1.msra.mxu0 %v2597_v52  ;;  %2095 = vmatpush3.msra.mxu1 %v2647_v7 }
 0x26c   :  { %854 = vmatprep.subr.mxu0 %v2601_v54  ;;  %2096 = vmatprep.subr.mxu1 %v3441_v35 }
 0x26d   :  { %855 = vmatpush1.msra.mxu0 %v2604_v55  ;;  %2097 = vmatpush3.msra.mxu1 %v2657_v10 }
 0x26e   :  { %856 = vmatprep.subr.mxu0 %v2608_v57  ;;  %2098 = vmatprep.subr.mxu1 %v3441_v35 }
 0x26f   :  { %857 = vmatpush1.msra.mxu0 %v2611_v58  ;;  %2099 = vmatpush3.msra.mxu1 %v2667_v13 }
 0x270   :  { %858 = vmatprep.subr.mxu0 %v2615_v60  ;;  %2100 = vmatprep.subr.mxu1 %v3441_v35 }
 0x271   :  { %859 = vmatpush1.msra.mxu0 %v2618_v61  ;;  %2101 = vmatpush3.msra.mxu1 %v2677_v16 }
 0x272   :  { %860 = vmatprep.subr.mxu0 %v2622_v62  ;;  %2102 = vmatprep.subr.mxu1 %v3441_v35 }
 0x273   :  { %861 = vmatpush1.msra.mxu0 %v2625_v63  ;;  %2103 = vmatpush3.msra.mxu1 %v2687_v19 }
 0x274   :  { %862 = vmatprep.subr.mxu0 %v2631_v2  ;;  %2104 = vmatprep.subr.mxu1 %v3441_v35 }
 0x275   :  { %863 = vmatpush1.msra.mxu0 %v2634_v3  ;;  %2105 = vmatpush3.msra.mxu1 %v2697_v22 }
 0x276   :  { %864 = vmatprep.subr.mxu0 %v2640_v5  ;;  %2106 = vmatprep.subr.mxu1 %v3441_v35 }
 0x277   :  { %865 = vmatpush1.msra.mxu0 %v2644_v6  ;;  %2107 = vmatpush3.msra.mxu1 %v2707_v25 }
 0x278   :  { %866 = vmatprep.subr.mxu0 %v2650_v8  ;;  %2108 = vmatprep.subr.mxu1 %v3441_v35 }
 0x279   :  { %867 = vmatpush1.msra.mxu0 %v2654_v9  ;;  %2109 = vmatpush3.msra.mxu1 %v2717_v28 }
 0x27a   :  { %868 = vmatprep.subr.mxu0 %v2660_v11  ;;  %2110 = vmatprep.subr.mxu1 %v3441_v35 }
 0x27b   :  { %869 = vmatpush1.msra.mxu0 %v2664_v12  ;;  %2111 = vmatpush3.msra.mxu1 %v2728_v30 }
 0x27c   :  { %870 = vmatprep.subr.mxu0 %v2670_v14  ;;  %2112 = vmatprep.subr.mxu1 %v3441_v35 }
 0x27d   :  { %871 = vmatpush1.msra.mxu0 %v2674_v15  ;;  %2113 = vmatpush3.msra.mxu1 %v2734_v31 }
 0x27e   :  { %872 = vmatprep.subr.mxu0 %v2680_v17  ;;  %2114 = vmatprep.subr.mxu1 %v3441_v35 }
 0x27f   :  { %873 = vmatpush1.msra.mxu0 %v2684_v18  ;;  %2115 = vmatpush3.msra.mxu1 %v2740_v32 }
 0x280   :  { %874 = vmatprep.subr.mxu0 %v2690_v20  ;;  %2116 = vmatprep.subr.mxu1 %v3441_v35 }
 0x281   :  { %875 = vmatpush1.msra.mxu0 %v2694_v21  ;;  %2117 = vmatpush3.msra.mxu1 %v2746_v33 }
 0x282   :  { %876 = vmatprep.subr.mxu0 %v2700_v23  ;;  %2118 = vmatprep.subr.mxu1 %v3441_v35 }
 0x283   :  { %877 = vmatpush1.msra.mxu0 %v3447_v24  ;;  %2119 = vmatpush3.msra.mxu1 %v3448_v40 }
 0x284   :  { %878 = vmatprep.subr.mxu0 %v3449_v29  ;;  %2120 = vmatprep.subr.mxu1 %v3441_v35 }
 0x285   :  { %879 = vmatpush1.msra.mxu0 %v3450_v36  ;;  %912 = vmatprep.mubr.f32.mxu0 %v3441_v35 }
 0x286   :  { %2121 = vmatpush3.msra.mxu1 %v3451_v50  ;;  %2122 = vmatprep.mubr.msk.f32.mxu1 %vm2517_vm0, %v3441_v35 }
 0x287   :  { %1029 = vmatprep.subr.mxu0 %v3452_v0  ;;  %2125 = vmatprep.subr.mxu1 %v3441_v35 }
 0x326   :  { %v733_v53 = vpop.f32.mrf.mxu0  ;;  %v804_v59 = vpop.f32.mrf.mxu1 }
 0x327   :  { %v809_v44 = vrot.slane %v733_v53, 6  ;;  %v828_v0 = vadd.f32 %v804_v59, %v2839_v43 }
 0x328   :  { %v2089_v27 = vpop.f32.mrf.mxu1  ;;  %v735_v34 = vpop.f32.mrf.mxu0 }
 0x329   :  { %v811_v37 = vadd.f32 %v809_v44, %v2830_v47  ;;  %v819_v38 = vrot.slane %v735_v34, 6  ;;  %v830_v29 = vrot.slane %v828_v0, 6  ;;  %v3081_v0 = vld [vmem:[#allocation7 + $0x168] sm:$0xff] }
 0x32b   :  { %v1785_v26 = vmul.f32 -1.442695, %v811_v37  ;;  %v821_v42 = vadd.f32 %v819_v38, %v2833_v45 }
 0x32d   :  { %2294 = vpow2.f32 %v1785_v26  ;;  %v1786_v36 = vmul.f32 -1.442695, %v821_v42 }
 0x33a   :  { %v2295_v41 = vpop.eup %2294 }
 0x33b   :  { %v815_v50 = vadd.f32 1.0, %v2295_v41 }
 0x33d   :  { %2296 = vrcp.f32 %v815_v50 }
 0x33e   :  { %2298 = vpow2.f32 %v1786_v36 }
 0x34a   :  { %v2297_v40 = vpop.eup %2296 }
 0x34b   :  { %v832_v24 = vmul.f32 %v2297_v40, %v830_v29  ;;  %v2299_v27 = vpop.eup %2298 }
 0x34c   :  { %v825_v44 = vadd.f32 1.0, %v2299_v27  ;;  %v3089_v27 = vld [vmem:[#allocation7 + $0x150] sm:$0xff] }
 0x34d   :  { %v833_v53 = vadd.f32 %v832_v24, %v2842_v56 }
 0x34f   :  { %2300 = vtanh.f32 %v833_v53  ;;  %v3085_v53 = vld [vmem:[#allocation7 + $0x158] sm:$0xff] }
 0x350   :  { %2302 = vrcp.f32 %v825_v44  ;;  %v3093_v44 = vld [vmem:[#allocation7 + $0x140] sm:$0xff] }
 0x35c   :  { %v2301_v37 = vpop.eup %2300 }
 0x35d   :  { %v836_v26 = vrot.slane %v2301_v37, 1  ;;  %v2303_v41 = vpop.eup %2302 }
 0x35f   :  { %v838_v34 = vsub.f32 %v2923_v39, %v836_v26  ;;  %v3105_v26 = vld [vmem:[#allocation7 + $0x120] sm:$0xff] }
 0x361   :  { %v840_v38 = vrot.slane %v838_v34, 7  ;;  %v3113_v34 = vld [vmem:[#allocation7 + $0x108] sm:$0xff] }
 0x363   :  { %v842_v50 = vmul.f32 %v2303_v41, %v840_v38  ;;  %v3121_v38 = vld [vmem:[#allocation7 + $0xf0] sm:$0xff]  ;;  %v3129_v41 = vld [vmem:[#allocation7 + $0xd8] sm:$0xff] }
 0x365   :  { %v2999_v42 = vadd.f32 %v2301_v37, %v842_v50  ;;  %v3097_v37 = vld [vmem:[#allocation7 + $0x138] sm:$0xff]  ;;  %v3137_v50 = vld [vmem:[#allocation7 + $0xc0] sm:$0xff] }
 0x367   :  { %844 = vst [vmem:[#allocation8] sm:$0x4] %v2999_v42  ;;  %v846_v36 = vrot.slane %v2999_v42, 2 }
 0x369   :  { %913 = vmatmul.mubr.f32.vlgmr.msra.gmra.mxu0 %v846_v36  ;;  %2123 = vmatmul.mubr.f32.vlgmr.msra.gmra.mxu1 %v846_v36  ;;  %v3153_v36 = vld [vmem:[#allocation7 + $0x90] sm:$0xff] }
 0x36a   :  { %1030 = vmatpush1.msra.mxu0 %v2585_v46  ;;  %2126 = vmatpush3.msra.mxu1 %v2628_v1  ;;  %v3453_v46 = vld [vmem:[#allocation16_spill] sm:$0xff] }
 0x36b   :  { %1031 = vmatprep.subr.mxu0 %v2587_v48  ;;  %2127 = vmatprep.subr.mxu1 %v3441_v35  ;;  %v3454_v48 = vld [vmem:[#allocation19_spill] sm:$0xff] }
 0x36c   :  { %1032 = vmatpush1.msra.mxu0 %v2591_v49  ;;  %2128 = vmatpush3.msra.mxu1 %v2637_v4  ;;  %v3455_v49 = vld [vmem:[#allocation17_spill] sm:$0xff] }
 0x36d   :  { %1033 = vmatprep.subr.mxu0 %v2594_v51  ;;  %2129 = vmatprep.subr.mxu1 %v3441_v35  ;;  %v3456_v51 = vld [vmem:[#allocation18_spill] sm:$0xff] }
 0x36e   :  { %1034 = vmatpush1.msra.mxu0 %v2597_v52  ;;  %2130 = vmatpush3.msra.mxu1 %v2647_v7  ;;  %v3457_v52 = vld [vmem:[#allocation20_spill] sm:$0xff] }
 0x36f   :  { %1035 = vmatprep.subr.mxu0 %v2601_v54  ;;  %2131 = vmatprep.subr.mxu1 %v3441_v35  ;;  %v3068_v54 = vld [vmem:[#allocation7 + $0x170] sm:$0xff] }
 0x370   :  { %1036 = vmatpush1.msra.mxu0 %v2604_v55  ;;  %2132 = vmatpush3.msra.mxu1 %v2657_v10 }
 0x371   :  { %1037 = vmatprep.subr.mxu0 %v2608_v57  ;;  %2133 = vmatprep.subr.mxu1 %v3441_v35 }
 0x372   :  { %1038 = vmatpush1.msra.mxu0 %v2611_v58  ;;  %2134 = vmatpush3.msra.mxu1 %v2667_v13 }
 0x373   :  { %1039 = vmatprep.subr.mxu0 %v2615_v60  ;;  %2135 = vmatprep.subr.mxu1 %v3441_v35 }
 0x374   :  { %1040 = vmatpush1.msra.mxu0 %v2618_v61  ;;  %2136 = vmatpush3.msra.mxu1 %v2677_v16 }
 0x375   :  { %1041 = vmatprep.subr.mxu0 %v2622_v62  ;;  %2137 = vmatprep.subr.mxu1 %v3441_v35 }
 0x376   :  { %1042 = vmatpush1.msra.mxu0 %v2625_v63  ;;  %2138 = vmatpush3.msra.mxu1 %v2687_v19 }
 0x377   :  { %1043 = vmatprep.subr.mxu0 %v2631_v2  ;;  %2139 = vmatprep.subr.mxu1 %v3441_v35 }
 0x378   :  { %1044 = vmatpush1.msra.mxu0 %v2634_v3  ;;  %2140 = vmatpush3.msra.mxu1 %v2697_v22 }
 0x379   :  { %1045 = vmatprep.subr.mxu0 %v2640_v5  ;;  %2141 = vmatprep.subr.mxu1 %v3441_v35 }
 0x37a   :  { %1046 = vmatpush1.msra.mxu0 %v2644_v6  ;;  %2142 = vmatpush3.msra.mxu1 %v2707_v25 }
 0x37b   :  { %1047 = vmatprep.subr.mxu0 %v2650_v8  ;;  %2143 = vmatprep.subr.mxu1 %v3441_v35 }
 0x37c   :  { %1048 = vmatpush1.msra.mxu0 %v2654_v9  ;;  %2144 = vmatpush3.msra.mxu1 %v2717_v28 }
 0x37d   :  { %1049 = vmatprep.subr.mxu0 %v2660_v11  ;;  %2145 = vmatprep.subr.mxu1 %v3441_v35 }
 0x37e   :  { %1050 = vmatpush1.msra.mxu0 %v2664_v12  ;;  %2146 = vmatpush3.msra.mxu1 %v2728_v30 }
 0x37f   :  { %1051 = vmatprep.subr.mxu0 %v2670_v14  ;;  %2147 = vmatprep.subr.mxu1 %v3441_v35 }
 0x380   :  { %1052 = vmatpush1.msra.mxu0 %v2674_v15  ;;  %2148 = vmatpush3.msra.mxu1 %v2734_v31 }
 0x381   :  { %1053 = vmatprep.subr.mxu0 %v2680_v17  ;;  %2149 = vmatprep.subr.mxu1 %v3441_v35 }
 0x382   :  { %1054 = vmatpush1.msra.mxu0 %v2684_v18  ;;  %2150 = vmatpush3.msra.mxu1 %v2740_v32 }
 0x383   :  { %1055 = vmatprep.subr.mxu0 %v2690_v20  ;;  %2151 = vmatprep.subr.mxu1 %v3441_v35 }
 0x384   :  { %1056 = vmatpush1.msra.mxu0 %v2694_v21  ;;  %2152 = vmatpush3.msra.mxu1 %v2746_v33 }
 0x385   :  { %1057 = vmatprep.subr.mxu0 %v2700_v23  ;;  %2153 = vmatprep.subr.mxu1 %v3441_v35 }
 0x386   :  { %1058 = vmatpush1.msra.mxu0 %v3453_v46  ;;  %2154 = vmatpush3.msra.mxu1 %v3454_v48 }
 0x387   :  { %1059 = vmatprep.subr.mxu0 %v3455_v49  ;;  %2155 = vmatprep.subr.mxu1 %v3441_v35 }
 0x388   :  { %1060 = vmatpush1.msra.mxu0 %v3456_v51  ;;  %1093 = vmatprep.mubr.f32.mxu0 %v3441_v35 }
 0x389   :  { %2156 = vmatpush3.msra.mxu1 %v3457_v52  ;;  %2157 = vmatprep.mubr.msk.f32.mxu1 %vm2517_vm0, %v3441_v35 }
 0x38a   :  { %1210 = vmatprep.subr.mxu0 %v3068_v54  ;;  %2160 = vmatprep.subr.mxu1 %v3441_v35 }
 0x429   :  { %v914_v55 = vpop.f32.mrf.mxu0  ;;  %v985_v57 = vpop.f32.mrf.mxu1 }
 0x42a   :  { %v990_v58 = vrot.slane %v914_v55, 5  ;;  %v1009_v9 = vadd.f32 %v985_v57, %v2839_v43  ;;  %v3161_v55 = vld [vmem:[#allocation7 + $0x78] sm:$0xff]  ;;  %v3169_v57 = vld [vmem:[#allocation7 + $0x60] sm:$0xff] }
 0x42b   :  { %v2124_v60 = vpop.f32.mrf.mxu1  ;;  %v916_v63 = vpop.f32.mrf.mxu0 }
 0x42c   :  { %v992_v61 = vadd.f32 %v990_v58, %v2830_v47  ;;  %v1000_v2 = vrot.slane %v916_v63, 5  ;;  %v1011_v11 = vrot.slane %v1009_v9, 5  ;;  %v3177_v58 = vld [vmem:[#allocation7 + $0x48] sm:$0xff]  ;;  %v3185_v60 = vld [vmem:[#allocation7 + $0x30] sm:$0xff] }
 0x42e   :  { %v1787_v62 = vmul.f32 -1.442695, %v992_v61  ;;  %v1002_v3 = vadd.f32 %v1000_v2, %v2833_v45 }
 0x430   :  { %2304 = vpow2.f32 %v1787_v62  ;;  %v1788_v8 = vmul.f32 -1.442695, %v1002_v3 }
 0x43d   :  { %v2305_v5 = vpop.eup %2304 }
 0x43e   :  { %v996_v6 = vadd.f32 1.0, %v2305_v5 }
 0x440   :  { %2306 = vrcp.f32 %v996_v6 }
 0x441   :  { %2308 = vpow2.f32 %v1788_v8 }
 0x44d   :  { %v2307_v12 = vpop.eup %2306 }
 0x44e   :  { %v1013_v14 = vmul.f32 %v2307_v12, %v1011_v11  ;;  %v2309_v17 = vpop.eup %2308 }
 0x44f   :  { %v1006_v18 = vadd.f32 1.0, %v2309_v17 }
 0x450   :  { %v1014_v15 = vadd.f32 %v1013_v14, %v2842_v56 }
 0x452   :  { %2310 = vtanh.f32 %v1014_v15 }
 0x453   :  { %2312 = vrcp.f32 %v1006_v18 }
 0x45f   :  { %v2311_v20 = vpop.eup %2310 }
 0x460   :  { %v1017_v21 = vrot.slane %v2311_v20, 1  ;;  %v2313_v24 = vpop.eup %2312 }
 0x462   :  { %v1019_v23 = vsub.f32 %v2999_v42, %v1017_v21  ;;  %v3145_v42 = vld [vmem:[#allocation7 + $0xa8] sm:$0xff] }
 0x464   :  { %v1021_v39 = vrot.slane %v1019_v23, 7 }
 0x466   :  { %v1023_v40 = vmul.f32 %v2313_v24, %v1021_v39 }
 0x468   :  { %v3077_v29 = vadd.f32 %v2311_v20, %v1023_v40  ;;  %v3214_v40 = vld [vmem:[#allocation7 + $0x178] sm:$0xff] }
 0x46a   :  { %1025 = vst [vmem:[#allocation8] sm:$0x8] %v3077_v29  ;;  %v1027_v59 = vrot.slane %v3077_v29, 3 }
 0x46c   :  { %1094 = vmatmul.mubr.f32.vlgmr.msra.gmra.mxu0 %v1027_v59  ;;  %2158 = vmatmul.mubr.f32.vlgmr.msra.gmra.mxu1 %v1027_v59  ;;  %v3226_v59 = vld [vmem:[#allocation7 + $0x148] sm:$0xff] }
 0x46d   :  { %1211 = vmatpush1.msra.mxu0 %v3081_v0  ;;  %2161 = vmatpush3.msra.mxu1 %v2628_v1  ;;  %v3101_v1 = vld [vmem:[#allocation7 + $0x128] sm:$0xff] }
 0x46e   :  { %1212 = vmatprep.subr.mxu0 %v3085_v53  ;;  %2162 = vmatprep.subr.mxu1 %v3441_v35 }
 0x46f   :  { %1213 = vmatpush1.msra.mxu0 %v3089_v27  ;;  %2163 = vmatpush3.msra.mxu1 %v2637_v4  ;;  %v3109_v4 = vld [vmem:[#allocation7 + $0x110] sm:$0xff] }
 0x470   :  { %1214 = vmatprep.subr.mxu0 %v3093_v44  ;;  %2164 = vmatprep.subr.mxu1 %v3441_v35 }
 0x471   :  { %1215 = vmatpush1.msra.mxu0 %v3097_v37  ;;  %2165 = vmatpush3.msra.mxu1 %v2647_v7  ;;  %v3117_v7 = vld [vmem:[#allocation7 + $0xf8] sm:$0xff] }
 0x472   :  { %1216 = vmatprep.subr.mxu0 %v3101_v1  ;;  %2166 = vmatprep.subr.mxu1 %v3441_v35 }
 0x473   :  { %1217 = vmatpush1.msra.mxu0 %v3105_v26  ;;  %2167 = vmatpush3.msra.mxu1 %v2657_v10  ;;  %v3125_v10 = vld [vmem:[#allocation7 + $0xe0] sm:$0xff] }
 0x474   :  { %1218 = vmatprep.subr.mxu0 %v3109_v4  ;;  %2168 = vmatprep.subr.mxu1 %v3441_v35 }
 0x475   :  { %1219 = vmatpush1.msra.mxu0 %v3113_v34  ;;  %2169 = vmatpush3.msra.mxu1 %v2667_v13  ;;  %v3133_v13 = vld [vmem:[#allocation7 + $0xc8] sm:$0xff] }
 0x476   :  { %1220 = vmatprep.subr.mxu0 %v3117_v7  ;;  %2170 = vmatprep.subr.mxu1 %v3441_v35 }
 0x477   :  { %1221 = vmatpush1.msra.mxu0 %v3121_v38  ;;  %2171 = vmatpush3.msra.mxu1 %v2677_v16  ;;  %v3141_v16 = vld [vmem:[#allocation7 + $0xb0] sm:$0xff] }
 0x478   :  { %1222 = vmatprep.subr.mxu0 %v3125_v10  ;;  %2172 = vmatprep.subr.mxu1 %v3441_v35 }
 0x479   :  { %1223 = vmatpush1.msra.mxu0 %v3129_v41  ;;  %2173 = vmatpush3.msra.mxu1 %v2687_v19  ;;  %v3149_v19 = vld [vmem:[#allocation7 + $0x98] sm:$0xff] }
 0x47a   :  { %1224 = vmatprep.subr.mxu0 %v3133_v13  ;;  %2174 = vmatprep.subr.mxu1 %v3441_v35 }
 0x47b   :  { %1225 = vmatpush1.msra.mxu0 %v3137_v50  ;;  %2175 = vmatpush3.msra.mxu1 %v2697_v22  ;;  %v3157_v22 = vld [vmem:[#allocation7 + $0x80] sm:$0xff] }
 0x47c   :  { %1226 = vmatprep.subr.mxu0 %v3141_v16  ;;  %2176 = vmatprep.subr.mxu1 %v3441_v35 }
 0x47d   :  { %1227 = vmatpush1.msra.mxu0 %v3145_v42  ;;  %2177 = vmatpush3.msra.mxu1 %v2707_v25  ;;  %v3165_v25 = vld [vmem:[#allocation7 + $0x68] sm:$0xff] }
 0x47e   :  { %1228 = vmatprep.subr.mxu0 %v3149_v19  ;;  %2178 = vmatprep.subr.mxu1 %v3441_v35 }
 0x47f   :  { %1229 = vmatpush1.msra.mxu0 %v3153_v36  ;;  %2179 = vmatpush3.msra.mxu1 %v2717_v28  ;;  %v3173_v28 = vld [vmem:[#allocation7 + $0x50] sm:$0xff] }
 0x480   :  { %1230 = vmatprep.subr.mxu0 %v3157_v22  ;;  %2180 = vmatprep.subr.mxu1 %v3441_v35 }
 0x481   :  { %1231 = vmatpush1.msra.mxu0 %v3161_v55  ;;  %2181 = vmatpush3.msra.mxu1 %v2728_v30  ;;  %v3181_v30 = vld [vmem:[#allocation7 + $0x38] sm:$0xff] }
 0x482   :  { %1232 = vmatprep.subr.mxu0 %v3165_v25  ;;  %2182 = vmatprep.subr.mxu1 %v3441_v35 }
 0x483   :  { %1233 = vmatpush1.msra.mxu0 %v3169_v57  ;;  %2183 = vmatpush3.msra.mxu1 %v2734_v31  ;;  %v3189_v31 = vld [vmem:[#allocation7 + $0x20] sm:$0xff] }
 0x484   :  { %1234 = vmatprep.subr.mxu0 %v3173_v28  ;;  %2184 = vmatprep.subr.mxu1 %v3441_v35 }
 0x485   :  { %1235 = vmatpush1.msra.mxu0 %v3177_v58  ;;  %2185 = vmatpush3.msra.mxu1 %v2740_v32 }
 0x486   :  { %1236 = vmatprep.subr.mxu0 %v3181_v30  ;;  %2186 = vmatprep.subr.mxu1 %v3441_v35 }
 0x487   :  { %1237 = vmatpush1.msra.mxu0 %v3185_v60  ;;  %2187 = vmatpush3.msra.mxu1 %v2746_v33 }
 0x488   :  { %1238 = vmatprep.subr.mxu0 %v3189_v31  ;;  %2188 = vmatprep.subr.mxu1 %v3441_v35 }
 0x489   :  { %1239 = vmatpush1.msra.mxu0 %v3453_v46  ;;  %2189 = vmatpush3.msra.mxu1 %v3454_v48 }
 0x48a   :  { %1240 = vmatprep.subr.mxu0 %v3455_v49  ;;  %2190 = vmatprep.subr.mxu1 %v3441_v35 }
 0x48b   :  { %1241 = vmatpush1.msra.mxu0 %v3456_v51  ;;  %1274 = vmatprep.mubr.f32.mxu0 %v3441_v35 }
 0x48c   :  { %2191 = vmatpush3.msra.mxu1 %v3457_v52  ;;  %2192 = vmatprep.mubr.msk.f32.mxu1 %vm2517_vm0, %v3441_v35 }
 0x48d   :  { %1391 = vmatprep.subr.mxu0 %v3068_v54  ;;  %2195 = vmatprep.subr.mxu1 %v3441_v35 }
 0x52c   :  { %v1095_v32 = vpop.f32.mrf.mxu0  ;;  %v1166_v33 = vpop.f32.mrf.mxu1 }
 0x52d   :  { %v1171_v46 = vrot.slane %v1095_v32, 4  ;;  %v1190_v5 = vadd.f32 %v1166_v33, %v2839_v43  ;;  %v3232_v32 = vld [vmem:[#allocation7 + $0x130] sm:$0xff]  ;;  %v3238_v33 = vld [vmem:[#allocation7 + $0x118] sm:$0xff] }
 0x52e   :  { %v2159_v48 = vpop.f32.mrf.mxu1  ;;  %v1097_v51 = vpop.f32.mrf.mxu0 }
 0x52f   :  { %v1173_v49 = vadd.f32 %v1171_v46, %v2830_v47  ;;  %v1181_v62 = vrot.slane %v1097_v51, 4  ;;  %v1192_v6 = vrot.slane %v1190_v5, 4  ;;  %v3244_v46 = vld [vmem:[#allocation7 + $0x100] sm:$0xff]  ;;  %v3250_v48 = vld [vmem:[#allocation7 + $0xe8] sm:$0xff] }
 0x530   :  { %v3268_v51 = vld [vmem:[#allocation7 + $0xa0] sm:$0xff]  ;;  %v3300_v5 = vld [vmem:[#allocation7 + $0x28] sm:$0xff] }
 0x531   :  { %v1789_v61 = vmul.f32 -1.442695, %v1173_v49  ;;  %v1183_v63 = vadd.f32 %v1181_v62, %v2833_v45  ;;  %v3256_v49 = vld [vmem:[#allocation7 + $0xd0] sm:$0xff]  ;;  %v3274_v62 = vld [vmem:[#allocation7 + $0x88] sm:$0xff]  ;;  %3459 = vst [vmem:[#allocation16_spill] sm:$0xff] %v3300_v5 }
 0x533   :  { %2314 = vpow2.f32 %v1789_v61  ;;  %v1790_v3 = vmul.f32 -1.442695, %v1183_v63  ;;  %v3262_v61 = vld [vmem:[#allocation7 + $0xb8] sm:$0xff]  ;;  %v3280_v63 = vld [vmem:[#allocation7 + $0x70] sm:$0xff] }
 0x540   :  { %v2315_v52 = vpop.eup %2314 }
 0x541   :  { %v1177_v2 = vadd.f32 1.0, %v2315_v52  ;;  %v3286_v52 = vld [vmem:[#allocation7 + $0x58] sm:$0xff] }
 0x543   :  { %2316 = vrcp.f32 %v1177_v2  ;;  %v3292_v2 = vld [vmem:[#allocation7 + $0x40] sm:$0xff] }
 0x544   :  { %2318 = vpow2.f32 %v1790_v3  ;;  %v3297_v3 = vld [vmem:[#allocation7 + $0x18] sm:$0xff] }
 0x545   :  { %3458 = vst [vmem:[#allocation15_spill] sm:$0xff] %v3297_v3 }
 0x550   :  { %v2317_v8 = vpop.eup %2316 }
 0x551   :  { %v1194_v9 = vmul.f32 %v2317_v8, %v1192_v6  ;;  %v2319_v12 = vpop.eup %2318  ;;  %v3303_v6 = vld [vmem:[#allocation7 + $0x8] sm:$0xff]  ;;  %v3307_v8 = vld [vmem:[#allocation7] sm:$0xff] }
 0x552   :  { %v1187_v14 = vadd.f32 1.0, %v2319_v12  ;;  %3460 = vst [vmem:[#allocation19_spill] sm:$0xff] %v3303_v6  ;;  %3461 = vst [vmem:[#allocation17_spill] sm:$0xff] %v3307_v8 }
 0x553   :  { %v1195_v11 = vadd.f32 %v1194_v9, %v2842_v56  ;;  %v3311_v9 = vld [vmem:[#allocation7 + $0x10] sm:$0xff] }
 0x554   :  { %3462 = vst [vmem:[#allocation18_spill] sm:$0xff] %v3311_v9 }
 0x555   :  { %2320 = vtanh.f32 %v1195_v11 }
 0x556   :  { %2322 = vrcp.f32 %v1187_v14 }
 0x562   :  { %v2321_v15 = vpop.eup %2320 }
 0x563   :  { %v1198_v17 = vrot.slane %v2321_v15, 1  ;;  %v2323_v21 = vpop.eup %2322 }
 0x565   :  { %v1200_v18 = vsub.f32 %v3077_v29, %v1198_v17  ;;  %v3220_v29 = vld [vmem:[#allocation7 + $0x160] sm:$0xff] }
 0x567   :  { %v1202_v20 = vrot.slane %v1200_v18, 7 }
 0x569   :  { %v1204_v23 = vmul.f32 %v2323_v21, %v1202_v20 }
 0x56b   :  { %v3209_v39 = vadd.f32 %v2321_v15, %v1204_v23 }
 0x56d   :  { %1206 = vst [vmem:[#allocation8] sm:$0x10] %v3209_v39  ;;  %v1208_v24 = vrot.slane %v3209_v39, 4 }
 0x56f   :  { %1275 = vmatmul.mubr.f32.vlgmr.msra.gmra.mxu0 %v1208_v24  ;;  %2193 = vmatmul.mubr.f32.vlgmr.msra.gmra.mxu1 %v1208_v24 }
 0x570   :  { %1392 = vmatpush1.msra.mxu0 %v3081_v0  ;;  %2196 = vmatpush3.msra.mxu1 %v3214_v40 }
 0x571   :  { %1393 = vmatprep.subr.mxu0 %v3085_v53  ;;  %2197 = vmatprep.subr.mxu1 %v3441_v35 }
 0x572   :  { %1394 = vmatpush1.msra.mxu0 %v3089_v27  ;;  %2198 = vmatpush3.msra.mxu1 %v3220_v29 }
 0x573   :  { %1395 = vmatprep.subr.mxu0 %v3093_v44  ;;  %2199 = vmatprep.subr.mxu1 %v3441_v35 }
 0x574   :  { %1396 = vmatpush1.msra.mxu0 %v3097_v37  ;;  %2200 = vmatpush3.msra.mxu1 %v3226_v59 }
 0x575   :  { %1397 = vmatprep.subr.mxu0 %v3101_v1  ;;  %2201 = vmatprep.subr.mxu1 %v3441_v35 }
 0x576   :  { %1398 = vmatpush1.msra.mxu0 %v3105_v26  ;;  %2202 = vmatpush3.msra.mxu1 %v3232_v32 }
 0x577   :  { %1399 = vmatprep.subr.mxu0 %v3109_v4  ;;  %2203 = vmatprep.subr.mxu1 %v3441_v35 }
 0x578   :  { %1400 = vmatpush1.msra.mxu0 %v3113_v34  ;;  %2204 = vmatpush3.msra.mxu1 %v3238_v33 }
 0x579   :  { %1401 = vmatprep.subr.mxu0 %v3117_v7  ;;  %2205 = vmatprep.subr.mxu1 %v3441_v35 }
 0x57a   :  { %1402 = vmatpush1.msra.mxu0 %v3121_v38  ;;  %2206 = vmatpush3.msra.mxu1 %v3244_v46 }
 0x57b   :  { %1403 = vmatprep.subr.mxu0 %v3125_v10  ;;  %2207 = vmatprep.subr.mxu1 %v3441_v35 }
 0x57c   :  { %1404 = vmatpush1.msra.mxu0 %v3129_v41  ;;  %2208 = vmatpush3.msra.mxu1 %v3250_v48 }
 0x57d   :  { %1405 = vmatprep.subr.mxu0 %v3133_v13  ;;  %2209 = vmatprep.subr.mxu1 %v3441_v35 }
 0x57e   :  { %1406 = vmatpush1.msra.mxu0 %v3137_v50  ;;  %2210 = vmatpush3.msra.mxu1 %v3256_v49 }
 0x57f   :  { %1407 = vmatprep.subr.mxu0 %v3141_v16  ;;  %2211 = vmatprep.subr.mxu1 %v3441_v35 }
 0x580   :  { %1408 = vmatpush1.msra.mxu0 %v3145_v42  ;;  %2212 = vmatpush3.msra.mxu1 %v3262_v61 }
 0x581   :  { %1409 = vmatprep.subr.mxu0 %v3149_v19  ;;  %2213 = vmatprep.subr.mxu1 %v3441_v35 }
 0x582   :  { %1410 = vmatpush1.msra.mxu0 %v3153_v36  ;;  %2214 = vmatpush3.msra.mxu1 %v3268_v51 }
 0x583   :  { %1411 = vmatprep.subr.mxu0 %v3157_v22  ;;  %2215 = vmatprep.subr.mxu1 %v3441_v35 }
 0x584   :  { %1412 = vmatpush1.msra.mxu0 %v3161_v55  ;;  %2216 = vmatpush3.msra.mxu1 %v3274_v62 }
 0x585   :  { %1413 = vmatprep.subr.mxu0 %v3165_v25  ;;  %2217 = vmatprep.subr.mxu1 %v3441_v35 }
 0x586   :  { %1414 = vmatpush1.msra.mxu0 %v3169_v57  ;;  %2218 = vmatpush3.msra.mxu1 %v3280_v63 }
 0x587   :  { %1415 = vmatprep.subr.mxu0 %v3173_v28  ;;  %2219 = vmatprep.subr.mxu1 %v3441_v35 }
 0x588   :  { %1416 = vmatpush1.msra.mxu0 %v3177_v58  ;;  %2220 = vmatpush3.msra.mxu1 %v3286_v52 }
 0x589   :  { %1417 = vmatprep.subr.mxu0 %v3181_v30  ;;  %2221 = vmatprep.subr.mxu1 %v3441_v35 }
 0x58a   :  { %1418 = vmatpush1.msra.mxu0 %v3185_v60  ;;  %2222 = vmatpush3.msra.mxu1 %v3292_v2 }
 0x58b   :  { %1419 = vmatprep.subr.mxu0 %v3189_v31  ;;  %2223 = vmatprep.subr.mxu1 %v3441_v35 }
 0x58c   :  { %1420 = vmatpush1.msra.mxu0 %v3297_v3  ;;  %2224 = vmatpush3.msra.mxu1 %v3300_v5 }
 0x58d   :  { %1421 = vmatprep.subr.mxu0 %v3303_v6  ;;  %2225 = vmatprep.subr.mxu1 %v3441_v35 }
 0x58e   :  { %1422 = vmatpush1.msra.mxu0 %v3307_v8  ;;  %1455 = vmatprep.mubr.f32.mxu0 %v3441_v35 }
 0x58f   :  { %2226 = vmatpush3.msra.mxu1 %v3311_v9  ;;  %2227 = vmatprep.mubr.msk.f32.mxu1 %vm2517_vm0, %v3441_v35 }
 0x590   :  { %1572 = vmatprep.subr.mxu0 %v3068_v54  ;;  %2230 = vmatprep.subr.mxu1 %v3441_v35 }
 0x62f   :  { %v1276_v11 = vpop.f32.mrf.mxu0  ;;  %v1347_v12 = vpop.f32.mrf.mxu1 }
 0x630   :  { %v1352_v14 = vrot.slane %v1276_v11, 3  ;;  %v1371_v54 = vadd.f32 %v1347_v12, %v2839_v43 }
 0x631   :  { %v2194_v15 = vpop.f32.mrf.mxu1  ;;  %v1278_v20 = vpop.f32.mrf.mxu0 }
 0x632   :  { %v1354_v17 = vadd.f32 %v1352_v14, %v2830_v47  ;;  %v1362_v21 = vrot.slane %v1278_v20, 3  ;;  %v1373_v6 = vrot.slane %v1371_v54, 3 }
 0x634   :  { %v1791_v18 = vmul.f32 -1.442695, %v1354_v17  ;;  %v1364_v23 = vadd.f32 %v1362_v21, %v2833_v45 }
 0x636   :  { %2324 = vpow2.f32 %v1791_v18  ;;  %v1792_v8 = vmul.f32 -1.442695, %v1364_v23 }
 0x643   :  { %v2325_v24 = vpop.eup %2324 }
 0x644   :  { %v1358_v9 = vadd.f32 1.0, %v2325_v24 }
 0x646   :  { %2326 = vrcp.f32 %v1358_v9 }
 0x647   :  { %2328 = vpow2.f32 %v1792_v8 }
 0x653   :  { %v2327_v5 = vpop.eup %2326 }
 0x654   :  { %v1375_v3 = vmul.f32 %v2327_v5, %v1373_v6  ;;  %v2329_v15 = vpop.eup %2328 }
 0x655   :  { %v1368_v14 = vadd.f32 1.0, %v2329_v15 }
 0x656   :  { %v1376_v11 = vadd.f32 %v1375_v3, %v2842_v56 }
 0x658   :  { %2330 = vtanh.f32 %v1376_v11 }
 0x659   :  { %2332 = vrcp.f32 %v1368_v14 }
 0x665   :  { %v2331_v17 = vpop.eup %2330 }
 0x666   :  { %v1379_v18 = vrot.slane %v2331_v17, 1  ;;  %v2333_v24 = vpop.eup %2332 }
 0x668   :  { %v1381_v20 = vsub.f32 %v3209_v39, %v1379_v18 }
 0x66a   :  { %v1383_v21 = vrot.slane %v1381_v20, 7 }
 0x66c   :  { %v1385_v9 = vmul.f32 %v2333_v24, %v1383_v21 }
 0x66e   :  { %v3323_v23 = vadd.f32 %v2331_v17, %v1385_v9 }
 0x670   :  { %1387 = vst [vmem:[#allocation8] sm:$0x20] %v3323_v23  ;;  %v1389_v43 = vrot.slane %v3323_v23, 5 }
 0x672   :  { %1456 = vmatmul.mubr.f32.vlgmr.msra.gmra.mxu0 %v1389_v43  ;;  %2228 = vmatmul.mubr.f32.vlgmr.msra.gmra.mxu1 %v1389_v43 }
 0x673   :  { %1573 = vmatpush1.msra.mxu0 %v3081_v0  ;;  %2231 = vmatpush3.msra.mxu1 %v3214_v40  ;;  %v3463_v0 = vld [vmem:[#allocation15_spill] sm:$0xff] }
 0x674   :  { %1574 = vmatprep.subr.mxu0 %v3085_v53  ;;  %2232 = vmatprep.subr.mxu1 %v3441_v35  ;;  %v3464_v53 = vld [vmem:[#allocation16_spill] sm:$0xff] }
 0x675   :  { %1575 = vmatpush1.msra.mxu0 %v3089_v27  ;;  %2233 = vmatpush3.msra.mxu1 %v3220_v29  ;;  %v3465_v27 = vld [vmem:[#allocation19_spill] sm:$0xff] }
 0x676   :  { %1576 = vmatprep.subr.mxu0 %v3093_v44  ;;  %2234 = vmatprep.subr.mxu1 %v3441_v35  ;;  %v3466_v44 = vld [vmem:[#allocation17_spill] sm:$0xff] }
 0x677   :  { %1577 = vmatpush1.msra.mxu0 %v3097_v37  ;;  %2235 = vmatpush3.msra.mxu1 %v3226_v59  ;;  %v3467_v37 = vld [vmem:[#allocation18_spill] sm:$0xff] }
 0x678   :  { %1578 = vmatprep.subr.mxu0 %v3101_v1  ;;  %2236 = vmatprep.subr.mxu1 %v3441_v35 }
 0x679   :  { %1579 = vmatpush1.msra.mxu0 %v3105_v26  ;;  %2237 = vmatpush3.msra.mxu1 %v3232_v32 }
 0x67a   :  { %1580 = vmatprep.subr.mxu0 %v3109_v4  ;;  %2238 = vmatprep.subr.mxu1 %v3441_v35 }
 0x67b   :  { %1581 = vmatpush1.msra.mxu0 %v3113_v34  ;;  %2239 = vmatpush3.msra.mxu1 %v3238_v33 }
 0x67c   :  { %1582 = vmatprep.subr.mxu0 %v3117_v7  ;;  %2240 = vmatprep.subr.mxu1 %v3441_v35 }
 0x67d   :  { %1583 = vmatpush1.msra.mxu0 %v3121_v38  ;;  %2241 = vmatpush3.msra.mxu1 %v3244_v46 }
 0x67e   :  { %1584 = vmatprep.subr.mxu0 %v3125_v10  ;;  %2242 = vmatprep.subr.mxu1 %v3441_v35 }
 0x67f   :  { %1585 = vmatpush1.msra.mxu0 %v3129_v41  ;;  %2243 = vmatpush3.msra.mxu1 %v3250_v48 }
 0x680   :  { %1586 = vmatprep.subr.mxu0 %v3133_v13  ;;  %2244 = vmatprep.subr.mxu1 %v3441_v35 }
 0x681   :  { %1587 = vmatpush1.msra.mxu0 %v3137_v50  ;;  %2245 = vmatpush3.msra.mxu1 %v3256_v49 }
 0x682   :  { %1588 = vmatprep.subr.mxu0 %v3141_v16  ;;  %2246 = vmatprep.subr.mxu1 %v3441_v35 }
 0x683   :  { %1589 = vmatpush1.msra.mxu0 %v3145_v42  ;;  %2247 = vmatpush3.msra.mxu1 %v3262_v61 }
 0x684   :  { %1590 = vmatprep.subr.mxu0 %v3149_v19  ;;  %2248 = vmatprep.subr.mxu1 %v3441_v35 }
 0x685   :  { %1591 = vmatpush1.msra.mxu0 %v3153_v36  ;;  %2249 = vmatpush3.msra.mxu1 %v3268_v51 }
 0x686   :  { %1592 = vmatprep.subr.mxu0 %v3157_v22  ;;  %2250 = vmatprep.subr.mxu1 %v3441_v35 }
 0x687   :  { %1593 = vmatpush1.msra.mxu0 %v3161_v55  ;;  %2251 = vmatpush3.msra.mxu1 %v3274_v62 }
 0x688   :  { %1594 = vmatprep.subr.mxu0 %v3165_v25  ;;  %2252 = vmatprep.subr.mxu1 %v3441_v35 }
 0x689   :  { %1595 = vmatpush1.msra.mxu0 %v3169_v57  ;;  %2253 = vmatpush3.msra.mxu1 %v3280_v63 }
 0x68a   :  { %1596 = vmatprep.subr.mxu0 %v3173_v28  ;;  %2254 = vmatprep.subr.mxu1 %v3441_v35 }
 0x68b   :  { %1597 = vmatpush1.msra.mxu0 %v3177_v58  ;;  %2255 = vmatpush3.msra.mxu1 %v3286_v52 }
 0x68c   :  { %1598 = vmatprep.subr.mxu0 %v3181_v30  ;;  %2256 = vmatprep.subr.mxu1 %v3441_v35 }
 0x68d   :  { %1599 = vmatpush1.msra.mxu0 %v3185_v60  ;;  %2257 = vmatpush3.msra.mxu1 %v3292_v2 }
 0x68e   :  { %1600 = vmatprep.subr.mxu0 %v3189_v31  ;;  %2258 = vmatprep.subr.mxu1 %v3441_v35 }
 0x68f   :  { %1601 = vmatpush1.msra.mxu0 %v3463_v0  ;;  %2259 = vmatpush3.msra.mxu1 %v3464_v53 }
 0x690   :  { %1602 = vmatprep.subr.mxu0 %v3465_v27  ;;  %2260 = vmatprep.subr.mxu1 %v3441_v35 }
 0x691   :  { %1603 = vmatpush1.msra.mxu0 %v3466_v44  ;;  %1636 = vmatprep.mubr.f32.mxu0 %v3441_v35 }
 0x692   :  { %2261 = vmatpush3.msra.mxu1 %v3467_v37  ;;  %2262 = vmatprep.mubr.msk.f32.mxu1 %vm2517_vm0, %v3441_v35  ;;  %v2402_v35 = vld [vmem:[%s3412_s4] sm:$0x1]  ;;  %s2518_s4 = smov [#allocation8]  }
 0x693   :  { %s1757_s21 = sshll.u32 %s2518_s4, 4  ;;  %s1758_s21 = int_to_ptr.vmem [resolvable:$true] %s1757_s21 }
 0x694   :  { %s2463_s24 = scalar_lea.vmem %s1758_s21, 128  ;;  %p2468_p2 = scmp.lt.s32.totalorder %s1758_s21, %s1758_s21 }
 0x695   :  { %p2464_p1 = scmp.ne.s32.totalorder %s1758_s21, %s2463_s24  ;;  %p2469_p3 = scmp.lt.s32.totalorder %s2463_s24, %s2463_s24 }
 0x697   :  { %p2470_p4 = por %p2469_p3, %p2468_p2 }
 0x699   :  { %p2471_p5 = pnand %p2470_p4, %p2464_p1 }
 0x732   :  { %v1457_v1 = vpop.f32.mrf.mxu0  ;;  %v1528_v26 = vpop.f32.mrf.mxu1 }
 0x733   :  { %v1533_v4 = vrot.slane %v1457_v1, 2  ;;  %v1552_v19 = vadd.f32 %v2402_v35, %v1528_v26 }
 0x734   :  { %v2229_v34 = vpop.f32.mrf.mxu1  ;;  %v1459_v10 = vpop.f32.mrf.mxu0 }
 0x735   :  { %v1535_v7 = vadd.f32 %v1533_v4, %v2830_v47  ;;  %v1543_v41 = vrot.slane %v1459_v10, 2  ;;  %v1554_v36 = vrot.slane %v1552_v19, 2 }
 0x737   :  { %v1793_v38 = vmul.f32 -1.442695, %v1535_v7  ;;  %v1545_v13 = vadd.f32 %v1543_v41, %v2833_v45 }
 0x739   :  { %2334 = vpow2.f32 %v1793_v38  ;;  %v1794_v42 = vmul.f32 -1.442695, %v1545_v13 }
 0x746   :  { %v2335_v50 = vpop.eup %2334 }
 0x747   :  { %v1539_v16 = vadd.f32 1.0, %v2335_v50 }
 0x749   :  { %2336 = vrcp.f32 %v1539_v16 }
 0x74a   :  { %2338 = vpow2.f32 %v1794_v42 }
 0x756   :  { %v2337_v22 = vpop.eup %2336 }
 0x757   :  { %v1556_v55 = vmul.f32 %v2337_v22, %v1554_v36  ;;  %v2339_v57 = vpop.eup %2338 }
 0x758   :  { %v1549_v28 = vadd.f32 1.0, %v2339_v57 }
 0x759   :  { %v1557_v25 = vadd.f32 %v1556_v55, %v2842_v56 }
 0x75b   :  { %2340 = vtanh.f32 %v1557_v25 }
 0x75c   :  { %2342 = vrcp.f32 %v1549_v28 }
 0x768   :  { %v2341_v58 = vpop.eup %2340 }
 0x769   :  { %v1560_v30 = vrot.slane %v2341_v58, 1  ;;  %v2343_v39 = vpop.eup %2342 }
 0x76b   :  { %v1562_v60 = vsub.f32 %v3323_v23, %v1560_v30 }
 0x76d   :  { %v1564_v31 = vrot.slane %v1562_v60, 7 }
 0x76f   :  { %v1566_v40 = vmul.f32 %v2343_v39, %v1564_v31 }
 0x771   :  { %v1567_v29 = vadd.f32 %v2341_v58, %v1566_v40 }
 0x773   :  { %1568 = vst [vmem:[#allocation8] sm:$0x40] %v1567_v29  ;;  %v1570_v59 = vrot.slane %v1567_v29, 6 }
 0x775   :  { %1637 = vmatmul.mubr.f32.vlgmr.msra.gmra.mxu0 %v1570_v59  ;;  %2263 = vmatmul.mubr.f32.vlgmr.msra.gmra.mxu1 %v1570_v59 }
 0x835   :  { %v1638_v32 = vpop.f32.mrf.mxu0  ;;  %v1709_v33 = vpop.f32.mrf.mxu1 }
 0x836   :  { %v1714_v46 = vrot.slane %v1638_v32, 1  ;;  %v1733_v5 = vadd.f32 %v2402_v35, %v1709_v33 }
 0x837   :  { %v2264_v48 = vpop.f32.mrf.mxu1  ;;  %v1640_v51 = vpop.f32.mrf.mxu0 }
 0x838   :  { %v1716_v49 = vadd.f32 %v1714_v46, %v2830_v47  ;;  %v1724_v62 = vrot.slane %v1640_v51, 1  ;;  %v1735_v6 = vrot.slane %v1733_v5, 1 }
 0x83a   :  { %v1795_v61 = vmul.f32 -1.442695, %v1716_v49  ;;  %v1726_v63 = vadd.f32 %v1724_v62, %v2833_v45 }
 0x83c   :  { %2344 = vpow2.f32 %v1795_v61  ;;  %v1796_v3 = vmul.f32 -1.442695, %v1726_v63 }
 0x849   :  { %v2345_v52 = vpop.eup %2344 }
 0x84a   :  { %v1720_v2 = vadd.f32 1.0, %v2345_v52 }
 0x84c   :  { %2346 = vrcp.f32 %v1720_v2 }
 0x84d   :  { %2348 = vpow2.f32 %v1796_v3 }
 0x859   :  { %v2347_v8 = vpop.eup %2346 }
 0x85a   :  { %v1737_v12 = vmul.f32 %v2347_v8, %v1735_v6  ;;  %v2349_v11 = vpop.eup %2348 }
 0x85b   :  { %v1730_v47 = vadd.f32 1.0, %v2349_v11 }
 0x85c   :  { %v1738_v54 = vadd.f32 %v1737_v12, %v2842_v56 }
 0x85e   :  { %2350 = vtanh.f32 %v1738_v54 }
 0x85f   :  { %2352 = vrcp.f32 %v1730_v47 }
 0x86b   :  { %v2351_v15 = vpop.eup %2350 }
 0x86c   :  { %v1741_v14 = vrot.slane %v2351_v15, 1  ;;  %v2353_v45 = vpop.eup %2352 }
 0x86e   :  { %v1743_v17 = vsub.f32 %v1567_v29, %v1741_v14 }
 0x870   :  { %v1745_v18 = vrot.slane %v1743_v17, 7 }
 0x872   :  { %v1747_v20 = vmul.f32 %v2353_v45, %v1745_v18 }
 0x874   :  { %v1748_v21 = vadd.f32 %v2351_v15, %v1747_v20 }
 0x876   :  { %1749 = vst [vmem:[#allocation8] sm:$0x80] %v1748_v21  ;;  %1750 = vst [vmem:[#allocation9 - $0x7] sm:$0x80] %v1748_v21 }
 0x877   :  { %2474 = shalt.err (!%p2471_p5)
}
 0x878   :  { %1760 = dma.vmem_to_hbm [thread:$0]  %s1758_s21, 128, %s3414_s6, [#allocation4]  }
 0x879   :  { %s2483_s27 = scalar_lea.vmem %s1768_s23, 16  ;;  %s2487_s28 = scalar_lea.vmem %s1768_s23, 32 }
 0x87a   :  { %p2484_p6 = scmp.ne.s32.totalorder %s1768_s23, %s2483_s27  ;;  %p2488_p7 = scmp.lt.s32.totalorder %s1768_s23, %s1768_s23 }
 0x87b   :  { %p2489_p8 = scmp.lt.s32.totalorder %s2487_s28, %s2483_s27 }
 0x87d   :  { %p2490_p9 = por %p2489_p8, %p2488_p7 }
 0x87f   :  { %p2491_p10 = pnand %p2490_p9, %p2484_p6 }
 0x881   :  { %2494 = shalt.err (!%p2491_p10)
}
 0x882   :  { %1770 = dma.vmem_to_hbm [thread:$0]  %s1768_s23, 16, %s3415_s7, [#allocation10]  }
 0x883   :  { %2507 = dma.done.wait [#allocation4], 128  }
 0x884   :  { %2508 = vsyncadd [#allocation4], 4294967168 }
 0x885   :  { %2509 = dma.done.wait [#allocation10], 16  }
 0x886   :  { %2510 = vsyncadd [#allocation10], 4294967280 }
 0x887   :  { %1777 = vsyncpa [#allocation3], 1 }
 0x888   :  { %1778 = vsyncpa [#allocation6], 1 }
 0x889   :  { %1779 = vsyncpa [#allocation4], 1 }
 0x88a   :  { %1780 = vsyncpa [#allocation10], 1 }

</bundles_post_ra>
